<compile_context>
chip_gen: v7x
topology: tpu7x:2x2x1
jax: 0.10.0
libtpu: 0.0.40
codegen_flags: <defaults>
</compile_context>

<pallas_src>
import jax
import jax.numpy as jnp
from jax.experimental import pallas as pl
from jax.experimental.pallas import tpu as pltpu


# ----------------------------- host-side glue -------------------------------
def _bilinear_matrix(in_size, out_size):
    """(out_size, in_size) interpolation weights matching
    F.interpolate(mode='bilinear', align_corners=False)."""
    o = jnp.arange(out_size, dtype=jnp.float32)
    coord = (o + 0.5) * (in_size / out_size) - 0.5
    coord = jnp.clip(coord, 0.0, in_size - 1)
    lo = jnp.floor(coord)
    hi = jnp.minimum(lo + 1, in_size - 1)
    w_hi = coord - lo
    w_lo = 1.0 - w_hi
    lo_i = lo.astype(jnp.int32)
    hi_i = hi.astype(jnp.int32)
    rows = jnp.arange(out_size)
    m = jnp.zeros((out_size, in_size), jnp.float32)
    m = m.at[rows, lo_i].add(w_lo)
    m = m.at[rows, hi_i].add(w_hi)
    return m


# --------------- fused kernel: resize + extractor + MSE partials -------------
def _fused_kernel(low_ref, gt_ref, rwt_ref, rh_ref, we_ref, be_ref,
                  wl_ref, bl_ref, out_ref):
    # low_ref/gt_ref: (1, C*Hin, Win) f32  — one image per step, channel-stacked rows
    # rwt_ref:        (Win, RES)      bf16 — width interpolation matrix (transposed)
    # rh_ref:         (RES, Hin)      f32  — height interpolation matrix
    # we_ref:         (RES, HIDDEN)   bf16 — patch-embed weight (resident)
    # be_ref:         (1, HIDDEN)     f32
    # wl_ref:         (L, HIDDEN, HIDDEN) bf16 — block weights (resident)
    # bl_ref:         (L, 1, HIDDEN)  f32
    # out_ref:        (1, 1, HIDDEN)  f32  — per-image-pair partial SSE (summed over layers)
    res, hin = rh_ref.shape
    c_dim = low_ref.shape[1] // hin
    n_layers = wl_ref.shape[0]
    hidden = we_ref.shape[1]
    m_side = c_dim * res                      # tokens per side for this image

    # ---- bilinear resize, width pass first as ONE big-M matmul over both sides
    x2 = jnp.concatenate([low_ref[0], gt_ref[0]], axis=0).astype(jnp.bfloat16)
    xw = jnp.dot(x2, rwt_ref[...],
                 preferred_element_type=jnp.float32)          # (2*C*Hin, RES) f32

    # height pass per (side, channel) in f32 (no bf16 quantization of the
    # intermediate); each result is (RES, RES), stacked into (2*C*RES, RES).
    rh = rh_ref[...]
    bands = []
    for k in range(2 * c_dim):
        bands.append(jnp.dot(rh, xw[k * hin:(k + 1) * hin, :],
                             preferred_element_type=jnp.float32))
    resized = jnp.concatenate(bands, axis=0)                   # (2*C*RES, RES) f32

    # ---- patch embed: tokens = rows of the channel-stacked resized image ----
    h = jnp.dot(resized.astype(jnp.bfloat16), we_ref[...],
                preferred_element_type=jnp.float32) + be_ref[...]   # (2*m, HIDDEN)

    # ---- 3 chained blocks; accumulate per-layer sum-of-squared-diffs ----
    sse = jnp.zeros((1, hidden), jnp.float32)
    for l in range(n_layers):
        h = jax.nn.gelu(
            jnp.dot(h.astype(jnp.bfloat16), wl_ref[l],
                    preferred_element_type=jnp.float32) + bl_ref[l],
            approximate=True)                                  # (2*m, HIDDEN) f32
        d = h[:m_side] - h[m_side:]                            # low - gt features
        sse = sse + jnp.sum(d * d, axis=0, keepdims=True)      # per-lane partial SSE
    out_ref[0] = sse


# --------------------------------- wrapper -----------------------------------
def ram_perceptual_loss(low_light, gt, w_embed, b_embed, w_layers, b_layers,
                        *, res):
    """low_light, gt: (B, C, H, W) f32.  Returns the scalar perceptual loss."""
    B, C, H, W = low_light.shape
    n_layers, hidden = w_layers.shape[0], w_layers.shape[-1]
    assert w_embed.shape == (res, hidden)
    assert (C * res) % 8 == 0

    # interpolation matrices (tiny, computed on host side of the jit)
    rh = _bilinear_matrix(H, res)                               # (res, H)  f32
    rwt = _bilinear_matrix(W, res).T.astype(jnp.bfloat16)       # (W, res)  bf16

    # free row-major reshape (no HBM copy): NCHW -> channel-stacked rows
    low2 = low_light.reshape(B, C * H, W)
    gt2 = gt.reshape(B, C * H, W)

    partials = pl.pallas_call(
        _fused_kernel,
        grid=(B,),
        in_specs=[
            pl.BlockSpec((1, C * H, W), lambda i: (i, 0, 0)),
            pl.BlockSpec((1, C * H, W), lambda i: (i, 0, 0)),
            pl.BlockSpec((W, res), lambda i: (0, 0)),
            pl.BlockSpec((res, H), lambda i: (0, 0)),
            pl.BlockSpec((res, hidden), lambda i: (0, 0)),
            pl.BlockSpec((1, hidden), lambda i: (0, 0)),
            pl.BlockSpec((n_layers, hidden, hidden), lambda i: (0, 0, 0)),
            pl.BlockSpec((n_layers, 1, hidden), lambda i: (0, 0, 0)),
        ],
        out_specs=pl.BlockSpec((1, 1, hidden), lambda i: (i, 0, 0)),
        out_shape=jax.ShapeDtypeStruct((B, 1, hidden), jnp.float32),
        compiler_params=pltpu.CompilerParams(
            dimension_semantics=("parallel",),
            vmem_limit_bytes=48 * 1024 * 1024),
    )(low2, gt2, rwt, rh,
      w_embed.astype(jnp.bfloat16), b_embed.astype(jnp.float32),
      w_layers.astype(jnp.bfloat16), b_layers.astype(jnp.float32))

    # F.mse_loss (mean) per layer, averaged over the layers:
    #   loss = sum_l SSE_l / (n_layers * n_tokens * hidden), n_tokens per side.
    n_tokens = B * C * res
    return jnp.sum(partials) / (n_layers * n_tokens * hidden)


if __name__ == "__main__":
    key = jax.random.PRNGKey(0)
    k1, k2, k3, k4, k5 = jax.random.split(key, 5)

    # small shapes consistent with the module's forward (NCHW RGB images)
    B, C, H, W = 2, 3, 16, 16
    RES = 32            # stand-in for the 384x384 RAM input resolution
    HIDDEN = 128

    low_light = jax.random.uniform(k1, (B, C, H, W), jnp.float32)
    gt = jax.random.uniform(k2, (B, C, H, W), jnp.float32)

    # deterministic synthetic "RAM" weights (no checkpoint load)
    w_embed = 0.05 * jax.random.normal(k3, (RES, HIDDEN), jnp.float32)
    b_embed = jnp.zeros((1, HIDDEN), jnp.float32)
    w_layers = 0.09 * jax.random.normal(k4, (3, HIDDEN, HIDDEN), jnp.float32)
    b_layers = 0.01 * jax.random.normal(k5, (3, 1, HIDDEN), jnp.float32)

    loss_fn = jax.jit(ram_perceptual_loss, static_argnames=("res",))
    loss = loss_fn(low_light, gt, w_embed, b_embed, w_layers, b_layers, res=RES)
    jax.block_until_ready(loss)
    assert bool(jnp.isfinite(loss)), "loss is not finite"
    print("KERNEL_OK")
</pallas_src>

<mosaic_0001>
module attributes {stable_mosaic.version = 11 : i64} {
  func.func private @main(%arg0: i32) attributes {dimension_semantics = [#tpu.dimension_semantics<core_parallel>], iteration_bounds = array<i64: 2>, tpu.core_type = #tpu.core_type<sc_scalar_subcore>, window_params = []} {
    return
  }
}

module attributes {stable_mosaic.version = 11 : i64} {
  func.func private @main(%arg0: i32) attributes {dimension_semantics = [#tpu.dimension_semantics<core_parallel>], iteration_bounds = array<i64: 2>, tpu.core_type = #tpu.core_type<sc_scalar_subcore>, window_params = []} {
    return
  }
}

module attributes {stable_mosaic.version = 11 : i64} {
  func.func @_fused_kernel(%arg0: i32, %arg1: memref<1x48x16xf32, #tpu.memory_space<vmem>>, %arg2: memref<1x48x16xf32, #tpu.memory_space<vmem>>, %arg3: memref<16x32xbf16, #tpu.memory_space<vmem>>, %arg4: memref<32x16xf32, #tpu.memory_space<vmem>>, %arg5: memref<32x128xbf16, #tpu.memory_space<vmem>>, %arg6: memref<1x128xf32, #tpu.memory_space<vmem>>, %arg7: memref<3x128x128xbf16, #tpu.memory_space<vmem>>, %arg8: memref<3x1x128xf32, #tpu.memory_space<vmem>>, %arg9: memref<1x1x128xf32, #tpu.memory_space<vmem>>) attributes {dimension_semantics = [#tpu.dimension_semantics<parallel>], iteration_bounds = array<i64: 2>, scalar_prefetch = 0 : i64, scratch_operands = 0 : i64, tpu.core_type = #tpu.core_type<tc>, window_params = [{transform_indices = @transform_0, window_bounds = array<i64: 1, 48, 16>}, {transform_indices = @transform_1, window_bounds = array<i64: 1, 48, 16>}, {pipeline_mode = #tpu.pipeline_mode<synchronous>, transform_indices = @transform_2, window_bounds = array<i64: 16, 32>}, {pipeline_mode = #tpu.pipeline_mode<synchronous>, transform_indices = @transform_3, window_bounds = array<i64: 32, 16>}, {pipeline_mode = #tpu.pipeline_mode<synchronous>, transform_indices = @transform_4, window_bounds = array<i64: 32, 128>}, {pipeline_mode = #tpu.pipeline_mode<synchronous>, transform_indices = @transform_5, window_bounds = array<i64: 1, 128>}, {pipeline_mode = #tpu.pipeline_mode<synchronous>, transform_indices = @transform_6, window_bounds = array<i64: 3, 128, 128>}, {pipeline_mode = #tpu.pipeline_mode<synchronous>, transform_indices = @transform_7, window_bounds = array<i64: 3, 1, 128>}, {transform_indices = @transform_8, window_bounds = array<i64: 1, 1, 128>}]} {
    %c0 = arith.constant 0 : index
    %c0_0 = arith.constant 0 : index
    %c0_1 = arith.constant 0 : index
    %0 = vector.load %arg1[%c0, %c0_0, %c0_1] : memref<1x48x16xf32, #tpu.memory_space<vmem>>, vector<1x48x16xf32>
    %1 = vector.shape_cast %0 : vector<1x48x16xf32> to vector<48x16xf32>
    %c0_2 = arith.constant 0 : index
    %c0_3 = arith.constant 0 : index
    %c0_4 = arith.constant 0 : index
    %2 = vector.load %arg2[%c0_2, %c0_3, %c0_4] : memref<1x48x16xf32, #tpu.memory_space<vmem>>, vector<1x48x16xf32>
    %3 = vector.shape_cast %2 : vector<1x48x16xf32> to vector<48x16xf32>
    %4 = tpu.concatenate %1, %3 in 0 : vector<48x16xf32>, vector<48x16xf32> -> vector<96x16xf32>
    %5 = arith.truncf %4 : vector<96x16xf32> to vector<96x16xbf16>
    %c0_5 = arith.constant 0 : index
    %c0_6 = arith.constant 0 : index
    %6 = vector.load %arg3[%c0_5, %c0_6] : memref<16x32xbf16, #tpu.memory_space<vmem>>, vector<16x32xbf16>
    %cst = arith.constant dense<0.000000e+00> : vector<96x32xf32>
    %7 = tpu.matmul %5, %6, %cst {dimension_numbers = #tpu.dot_dimension_numbers<[1], [0], [0], [1], [0, 0, 1, 1], [], []>} : vector<96x16xbf16>, vector<16x32xbf16>, vector<96x32xf32> -> vector<96x32xf32>
    %c0_7 = arith.constant 0 : index
    %c0_8 = arith.constant 0 : index
    %8 = vector.load %arg4[%c0_7, %c0_8] : memref<32x16xf32, #tpu.memory_space<vmem>>, vector<32x16xf32>
    %9 = vector.extract_strided_slice %7 {offsets = [0, 0], sizes = [16, 32], strides = [1, 1]} : vector<96x32xf32> to vector<16x32xf32>
    %cst_9 = arith.constant dense<0.000000e+00> : vector<32x32xf32>
    %10 = tpu.matmul %8, %9, %cst_9 {dimension_numbers = #tpu.dot_dimension_numbers<[1], [0], [0], [1], [0, 0, 1, 1], [], []>} : vector<32x16xf32>, vector<16x32xf32>, vector<32x32xf32> -> vector<32x32xf32>
    %11 = vector.extract_strided_slice %7 {offsets = [16, 0], sizes = [16, 32], strides = [1, 1]} : vector<96x32xf32> to vector<16x32xf32>
    %cst_10 = arith.constant dense<0.000000e+00> : vector<32x32xf32>
    %12 = tpu.matmul %8, %11, %cst_10 {dimension_numbers = #tpu.dot_dimension_numbers<[1], [0], [0], [1], [0, 0, 1, 1], [], []>} : vector<32x16xf32>, vector<16x32xf32>, vector<32x32xf32> -> vector<32x32xf32>
    %13 = vector.extract_strided_slice %7 {offsets = [32, 0], sizes = [16, 32], strides = [1, 1]} : vector<96x32xf32> to vector<16x32xf32>
    %cst_11 = arith.constant dense<0.000000e+00> : vector<32x32xf32>
    %14 = tpu.matmul %8, %13, %cst_11 {dimension_numbers = #tpu.dot_dimension_numbers<[1], [0], [0], [1], [0, 0, 1, 1], [], []>} : vector<32x16xf32>, vector<16x32xf32>, vector<32x32xf32> -> vector<32x32xf32>
    %15 = vector.extract_strided_slice %7 {offsets = [48, 0], sizes = [16, 32], strides = [1, 1]} : vector<96x32xf32> to vector<16x32xf32>
    %cst_12 = arith.constant dense<0.000000e+00> : vector<32x32xf32>
    %16 = tpu.matmul %8, %15, %cst_12 {dimension_numbers = #tpu.dot_dimension_numbers<[1], [0], [0], [1], [0, 0, 1, 1], [], []>} : vector<32x16xf32>, vector<16x32xf32>, vector<32x32xf32> -> vector<32x32xf32>
    %17 = vector.extract_strided_slice %7 {offsets = [64, 0], sizes = [16, 32], strides = [1, 1]} : vector<96x32xf32> to vector<16x32xf32>
    %cst_13 = arith.constant dense<0.000000e+00> : vector<32x32xf32>
    %18 = tpu.matmul %8, %17, %cst_13 {dimension_numbers = #tpu.dot_dimension_numbers<[1], [0], [0], [1], [0, 0, 1, 1], [], []>} : vector<32x16xf32>, vector<16x32xf32>, vector<32x32xf32> -> vector<32x32xf32>
    %19 = vector.extract_strided_slice %7 {offsets = [80, 0], sizes = [16, 32], strides = [1, 1]} : vector<96x32xf32> to vector<16x32xf32>
    %cst_14 = arith.constant dense<0.000000e+00> : vector<32x32xf32>
    %20 = tpu.matmul %8, %19, %cst_14 {dimension_numbers = #tpu.dot_dimension_numbers<[1], [0], [0], [1], [0, 0, 1, 1], [], []>} : vector<32x16xf32>, vector<16x32xf32>, vector<32x32xf32> -> vector<32x32xf32>
    %21 = tpu.concatenate %10, %12, %14, %16, %18, %20 in 0 : vector<32x32xf32>, vector<32x32xf32>, vector<32x32xf32>, vector<32x32xf32>, vector<32x32xf32>, vector<32x32xf32> -> vector<192x32xf32>
    %22 = arith.truncf %21 : vector<192x32xf32> to vector<192x32xbf16>
    %c0_15 = arith.constant 0 : index
    %c0_16 = arith.constant 0 : index
    %23 = vector.load %arg5[%c0_15, %c0_16] : memref<32x128xbf16, #tpu.memory_space<vmem>>, vector<32x128xbf16>
    %cst_17 = arith.constant dense<0.000000e+00> : vector<192x128xf32>
    %24 = tpu.matmul %22, %23, %cst_17 {dimension_numbers = #tpu.dot_dimension_numbers<[1], [0], [0], [1], [0, 0, 1, 1], [], []>} : vector<192x32xbf16>, vector<32x128xbf16>, vector<192x128xf32> -> vector<192x128xf32>
    %c0_18 = arith.constant 0 : index
    %c0_19 = arith.constant 0 : index
    %25 = vector.load %arg6[%c0_18, %c0_19] : memref<1x128xf32, #tpu.memory_space<vmem>>, vector<1x128xf32>
    %26 = vector.broadcast %25 : vector<1x128xf32> to vector<192x128xf32>
    %27 = arith.addf %24, %26 : vector<192x128xf32>
    %cst_20 = arith.constant 0.000000e+00 : f32
    %28 = vector.broadcast %cst_20 : f32 to vector<1x128xf32>
    %29 = arith.truncf %27 : vector<192x128xf32> to vector<192x128xbf16>
    %c0_21 = arith.constant 0 : index
    %c0_22 = arith.constant 0 : index
    %c0_23 = arith.constant 0 : index
    %30 = vector.load %arg7[%c0_21, %c0_22, %c0_23] : memref<3x128x128xbf16, #tpu.memory_space<vmem>>, vector<1x128x128xbf16>
    %31 = vector.shape_cast %30 : vector<1x128x128xbf16> to vector<128x128xbf16>
    %cst_24 = arith.constant dense<0.000000e+00> : vector<192x128xf32>
    %32 = tpu.matmul %29, %31, %cst_24 {dimension_numbers = #tpu.dot_dimension_numbers<[1], [0], [0], [1], [0, 0, 1, 1], [], []>} : vector<192x128xbf16>, vector<128x128xbf16>, vector<192x128xf32> -> vector<192x128xf32>
    %c0_25 = arith.constant 0 : index
    %c0_26 = arith.constant 0 : index
    %c0_27 = arith.constant 0 : index
    %33 = vector.load %arg8[%c0_25, %c0_26, %c0_27] : memref<3x1x128xf32, #tpu.memory_space<vmem>>, vector<1x1x128xf32>
    %34 = vector.shape_cast %33 : vector<1x1x128xf32> to vector<1x128xf32>
    %35 = vector.broadcast %34 : vector<1x128xf32> to vector<192x128xf32>
    %36 = arith.addf %32, %35 : vector<192x128xf32>
    %37 = arith.mulf %36, %36 : vector<192x128xf32>
    %38 = arith.mulf %36, %37 : vector<192x128xf32>
    %cst_28 = arith.constant 4.471500e-02 : f32
    %39 = vector.broadcast %cst_28 : f32 to vector<192x128xf32>
    %40 = arith.mulf %39, %38 : vector<192x128xf32>
    %41 = arith.addf %36, %40 : vector<192x128xf32>
    %cst_29 = arith.constant 0.797884583 : f32
    %42 = vector.broadcast %cst_29 : f32 to vector<192x128xf32>
    %43 = arith.mulf %42, %41 : vector<192x128xf32>
    %44 = math.tanh %43 : vector<192x128xf32>
    %cst_30 = arith.constant 1.000000e+00 : f32
    %45 = vector.broadcast %cst_30 : f32 to vector<192x128xf32>
    %46 = arith.addf %45, %44 : vector<192x128xf32>
    %cst_31 = arith.constant 5.000000e-01 : f32
    %47 = vector.broadcast %cst_31 : f32 to vector<192x128xf32>
    %48 = arith.mulf %47, %46 : vector<192x128xf32>
    %49 = arith.mulf %36, %48 : vector<192x128xf32>
    %50 = vector.extract_strided_slice %49 {offsets = [0, 0], sizes = [96, 128], strides = [1, 1]} : vector<192x128xf32> to vector<96x128xf32>
    %51 = vector.extract_strided_slice %49 {offsets = [96, 0], sizes = [96, 128], strides = [1, 1]} : vector<192x128xf32> to vector<96x128xf32>
    %52 = arith.subf %50, %51 : vector<96x128xf32>
    %53 = arith.mulf %52, %52 : vector<96x128xf32>
    %cst_32 = arith.constant dense<0.000000e+00> : vector<128xf32>
    %54 = vector.multi_reduction <add>, %53, %cst_32 [0] : vector<96x128xf32> to vector<128xf32>
    %55 = vector.shape_cast %54 : vector<128xf32> to vector<1x128xf32>
    %56 = arith.addf %28, %55 : vector<1x128xf32>
    %57 = arith.truncf %49 : vector<192x128xf32> to vector<192x128xbf16>
    %c1 = arith.constant 1 : index
    %c0_33 = arith.constant 0 : index
    %c0_34 = arith.constant 0 : index
    %58 = vector.load %arg7[%c1, %c0_33, %c0_34] : memref<3x128x128xbf16, #tpu.memory_space<vmem>>, vector<1x128x128xbf16>
    %59 = vector.shape_cast %58 : vector<1x128x128xbf16> to vector<128x128xbf16>
    %cst_35 = arith.constant dense<0.000000e+00> : vector<192x128xf32>
    %60 = tpu.matmul %57, %59, %cst_35 {dimension_numbers = #tpu.dot_dimension_numbers<[1], [0], [0], [1], [0, 0, 1, 1], [], []>} : vector<192x128xbf16>, vector<128x128xbf16>, vector<192x128xf32> -> vector<192x128xf32>
    %c1_36 = arith.constant 1 : index
    %c0_37 = arith.constant 0 : index
    %c0_38 = arith.constant 0 : index
    %61 = vector.load %arg8[%c1_36, %c0_37, %c0_38] : memref<3x1x128xf32, #tpu.memory_space<vmem>>, vector<1x1x128xf32>
    %62 = vector.shape_cast %61 : vector<1x1x128xf32> to vector<1x128xf32>
    %63 = vector.broadcast %62 : vector<1x128xf32> to vector<192x128xf32>
    %64 = arith.addf %60, %63 : vector<192x128xf32>
    %65 = arith.mulf %64, %64 : vector<192x128xf32>
    %66 = arith.mulf %64, %65 : vector<192x128xf32>
    %cst_39 = arith.constant 4.471500e-02 : f32
    %67 = vector.broadcast %cst_39 : f32 to vector<192x128xf32>
    %68 = arith.mulf %67, %66 : vector<192x128xf32>
    %69 = arith.addf %64, %68 : vector<192x128xf32>
    %cst_40 = arith.constant 0.797884583 : f32
    %70 = vector.broadcast %cst_40 : f32 to vector<192x128xf32>
    %71 = arith.mulf %70, %69 : vector<192x128xf32>
    %72 = math.tanh %71 : vector<192x128xf32>
    %cst_41 = arith.constant 1.000000e+00 : f32
    %73 = vector.broadcast %cst_41 : f32 to vector<192x128xf32>
    %74 = arith.addf %73, %72 : vector<192x128xf32>
    %cst_42 = arith.constant 5.000000e-01 : f32
    %75 = vector.broadcast %cst_42 : f32 to vector<192x128xf32>
    %76 = arith.mulf %75, %74 : vector<192x128xf32>
    %77 = arith.mulf %64, %76 : vector<192x128xf32>
    %78 = vector.extract_strided_slice %77 {offsets = [0, 0], sizes = [96, 128], strides = [1, 1]} : vector<192x128xf32> to vector<96x128xf32>
    %79 = vector.extract_strided_slice %77 {offsets = [96, 0], sizes = [96, 128], strides = [1, 1]} : vector<192x128xf32> to vector<96x128xf32>
    %80 = arith.subf %78, %79 : vector<96x128xf32>
    %81 = arith.mulf %80, %80 : vector<96x128xf32>
    %cst_43 = arith.constant dense<0.000000e+00> : vector<128xf32>
    %82 = vector.multi_reduction <add>, %81, %cst_43 [0] : vector<96x128xf32> to vector<128xf32>
    %83 = vector.shape_cast %82 : vector<128xf32> to vector<1x128xf32>
    %84 = arith.addf %56, %83 : vector<1x128xf32>
    %85 = arith.truncf %77 : vector<192x128xf32> to vector<192x128xbf16>
    %c2 = arith.constant 2 : index
    %c0_44 = arith.constant 0 : index
    %c0_45 = arith.constant 0 : index
    %86 = vector.load %arg7[%c2, %c0_44, %c0_45] : memref<3x128x128xbf16, #tpu.memory_space<vmem>>, vector<1x128x128xbf16>
    %87 = vector.shape_cast %86 : vector<1x128x128xbf16> to vector<128x128xbf16>
    %cst_46 = arith.constant dense<0.000000e+00> : vector<192x128xf32>
    %88 = tpu.matmul %85, %87, %cst_46 {dimension_numbers = #tpu.dot_dimension_numbers<[1], [0], [0], [1], [0, 0, 1, 1], [], []>} : vector<192x128xbf16>, vector<128x128xbf16>, vector<192x128xf32> -> vector<192x128xf32>
    %c2_47 = arith.constant 2 : index
    %c0_48 = arith.constant 0 : index
    %c0_49 = arith.constant 0 : index
    %89 = vector.load %arg8[%c2_47, %c0_48, %c0_49] : memref<3x1x128xf32, #tpu.memory_space<vmem>>, vector<1x1x128xf32>
    %90 = vector.shape_cast %89 : vector<1x1x128xf32> to vector<1x128xf32>
    %91 = vector.broadcast %90 : vector<1x128xf32> to vector<192x128xf32>
    %92 = arith.addf %88, %91 : vector<192x128xf32>
    %93 = arith.mulf %92, %92 : vector<192x128xf32>
    %94 = arith.mulf %92, %93 : vector<192x128xf32>
    %cst_50 = arith.constant 4.471500e-02 : f32
    %95 = vector.broadcast %cst_50 : f32 to vector<192x128xf32>
    %96 = arith.mulf %95, %94 : vector<192x128xf32>
    %97 = arith.addf %92, %96 : vector<192x128xf32>
    %cst_51 = arith.constant 0.797884583 : f32
    %98 = vector.broadcast %cst_51 : f32 to vector<192x128xf32>
    %99 = arith.mulf %98, %97 : vector<192x128xf32>
    %100 = math.tanh %99 : vector<192x128xf32>
    %cst_52 = arith.constant 1.000000e+00 : f32
    %101 = vector.broadcast %cst_52 : f32 to vector<192x128xf32>
    %102 = arith.addf %101, %100 : vector<192x128xf32>
    %cst_53 = arith.constant 5.000000e-01 : f32
    %103 = vector.broadcast %cst_53 : f32 to vector<192x128xf32>
    %104 = arith.mulf %103, %102 : vector<192x128xf32>
    %105 = arith.mulf %92, %104 : vector<192x128xf32>
    %106 = vector.extract_strided_slice %105 {offsets = [0, 0], sizes = [96, 128], strides = [1, 1]} : vector<192x128xf32> to vector<96x128xf32>
    %107 = vector.extract_strided_slice %105 {offsets = [96, 0], sizes = [96, 128], strides = [1, 1]} : vector<192x128xf32> to vector<96x128xf32>
    %108 = arith.subf %106, %107 : vector<96x128xf32>
    %109 = arith.mulf %108, %108 : vector<96x128xf32>
    %cst_54 = arith.constant dense<0.000000e+00> : vector<128xf32>
    %110 = vector.multi_reduction <add>, %109, %cst_54 [0] : vector<96x128xf32> to vector<128xf32>
    %111 = vector.shape_cast %110 : vector<128xf32> to vector<1x128xf32>
    %112 = arith.addf %84, %111 : vector<1x128xf32>
    %c0_55 = arith.constant 0 : index
    %c0_56 = arith.constant 0 : index
    %c0_57 = arith.constant 0 : index
    %113 = vector.load %arg9[%c0_55, %c0_56, %c0_57] : memref<1x1x128xf32, #tpu.memory_space<vmem>>, vector<1x1x128xf32>
    %114 = vector.shape_cast %113 : vector<1x1x128xf32> to vector<1x128xf32>
    %115 = vector.shape_cast %112 : vector<1x128xf32> to vector<1x1x128xf32>
    tpu.vector_store %arg9[%c0_55, %c0_56, %c0_57], %115 {strides = array<i32>} : memref<1x1x128xf32, #tpu.memory_space<vmem>>, vector<1x1x128xf32>,
    return
  }
  func.func @transform_0(%arg0: i32) -> (i32, i32, i32) {
    %c0_i32 = arith.constant 0 : i32
    %c0_i32_0 = arith.constant 0 : i32
    %c0_i32_1 = arith.constant 0 : i32
    return %arg0, %c0_i32, %c0_i32_0 : i32, i32, i32
  }
  func.func @transform_1(%arg0: i32) -> (i32, i32, i32) {
    %c0_i32 = arith.constant 0 : i32
    %c0_i32_0 = arith.constant 0 : i32
    %c0_i32_1 = arith.constant 0 : i32
    return %arg0, %c0_i32, %c0_i32_0 : i32, i32, i32
  }
  func.func @transform_2(%arg0: i32) -> (i32, i32) {
    %c0_i32 = arith.constant 0 : i32
    %c0_i32_0 = arith.constant 0 : i32
    %c0_i32_1 = arith.constant 0 : i32
    return %c0_i32, %c0_i32_0 : i32, i32
  }
  func.func @transform_3(%arg0: i32) -> (i32, i32) {
    %c0_i32 = arith.constant 0 : i32
    %c0_i32_0 = arith.constant 0 : i32
    %c0_i32_1 = arith.constant 0 : i32
    return %c0_i32, %c0_i32_0 : i32, i32
  }
  func.func @transform_4(%arg0: i32) -> (i32, i32) {
    %c0_i32 = arith.constant 0 : i32
    %c0_i32_0 = arith.constant 0 : i32
    %c0_i32_1 = arith.constant 0 : i32
    return %c0_i32, %c0_i32_0 : i32, i32
  }
  func.func @transform_5(%arg0: i32) -> (i32, i32) {
    %c0_i32 = arith.constant 0 : i32
    %c0_i32_0 = arith.constant 0 : i32
    %c0_i32_1 = arith.constant 0 : i32
    return %c0_i32, %c0_i32_0 : i32, i32
  }
  func.func @transform_6(%arg0: i32) -> (i32, i32, i32) {
    %c0_i32 = arith.constant 0 : i32
    %c0_i32_0 = arith.constant 0 : i32
    %c0_i32_1 = arith.constant 0 : i32
    %c0_i32_2 = arith.constant 0 : i32
    return %c0_i32, %c0_i32_0, %c0_i32_1 : i32, i32, i32
  }
  func.func @transform_7(%arg0: i32) -> (i32, i32, i32) {
    %c0_i32 = arith.constant 0 : i32
    %c0_i32_0 = arith.constant 0 : i32
    %c0_i32_1 = arith.constant 0 : i32
    %c0_i32_2 = arith.constant 0 : i32
    return %c0_i32, %c0_i32_0, %c0_i32_1 : i32, i32, i32
  }
  func.func @transform_8(%arg0: i32) -> (i32, i32, i32) {
    %c0_i32 = arith.constant 0 : i32
    %c0_i32_0 = arith.constant 0 : i32
    %c0_i32_1 = arith.constant 0 : i32
    return %arg0, %c0_i32, %c0_i32_0 : i32, i32, i32
  }
}

</mosaic_0001>

<bundles_post_ra>
// kernel: ram_perceptual_loss.1
= control target key start
LH: loop header
LB: loop body
LE: loop exit
PB: predicated region body
PF: predicated region fallthrough
CT: control target
= control target key end

     0   :  { %s3364_s27 = smov 0   ;;  %s4309_s0 = inlined_call_operand.vmem [shape: f32[2,48,16], index: 0, kind: input, shape index: {}]   ;;  %s4310_s1 = inlined_call_operand.vmem [shape: f32[2,48,16], index: 1, kind: input, shape index: {}]   ;;  %s4311_s2 = inlined_call_operand.vmem [shape: bf16[16,32], index: 2, kind: input, shape index: {}]   ;;  %s4312_s3 = inlined_call_operand.vmem [shape: f32[32,16], index: 3, kind: input, shape index: {}]   ;;  %s4313_s4 = inlined_call_operand.vmem [shape: bf16[32,128], index: 4, kind: input, shape index: {}]   ;;  %s4314_s5 = inlined_call_operand.vmem [shape: f32[1,128], index: 5, kind: input, shape index: {}]   ;;  %s4315_s6 = inlined_call_operand.vmem [shape: bf16[3,128,128], index: 6, kind: input, shape index: {}]   ;;  %s4316_s7 = inlined_call_operand.vmem [shape: f32[3,1,128], index: 7, kind: input, shape index: {}]   ;;  %s4317_s8 = inlined_call_operand.vmem [shape: f32[2,1,128], index: 8, kind: output, shape index: {}]  }
   0x1 LB: > { %s2650_s28 = sadd.s32 4294967295, %s3317_s27   ;;  %p2654_p0 = scmp.ge.s32.totalorder %s3317_s27, 1  ;;  %s3317_s27 = sphi %s3364_s27, %s18_s27  }
   0x2   : > { %p272_p1 = scmp.lt.s32.totalorder %s3317_s27, 3 }
   0x4   : > { %p273_p2 = pnand %p2654_p0, %p272_p1 }
   0x5   : > { %v3140_v0 = vld [vmem:[%s4311_s2] sm:$0xff] (!%p273_p2)   ;;  %p309_p3 = scmp.lt.s32.totalorder (!%p273_p2), %s2650_s28, 1  ;;  %vm349_vm0 = vcmask (!%p273_p2), 130048   ;;  %v450_v32 = vld [vmem:[%s4312_s3 + $0x8] sm:$0xff] (!%p273_p2)  ;;  %v451_v33 = vld [vmem:[%s4312_s3 + $0x10] sm:$0xff] (!%p273_p2)  ;;  %vm1010_vm1 = vcmask (!%p273_p2), 261120  }
   0x6   : > { %276 = sbr.rel (%p273_p2) target bundleno = 1521 (0x5f1), region = 52  ;;  %2883 = vmatprep.subr.bf16.mxu0 (!%p273_p2), %v3140_v0  ;;  %3129 = vmatprep.subr.bf16.mxu1 (!%p273_p2), %v3140_v0  ;;  %v449_v19 = vld [vmem:[%s4312_s3] sm:$0xff] (!%p273_p2)  ;;  %v452_v36 = vld [vmem:[%s4312_s3 + $0x18] sm:$0xff] (!%p273_p2)  ;;  %v3142_v42 = vld [vmem:[%s4313_s4 + $0x8] sm:$0xff] (!%p273_p2)  }
   0x7   : > { %2884 = vmatpush3.bf16.msra.mxu0 (!%p273_p2), %v3140_v0  ;;  %3130 = vmatpush3.bf16.msra.mxu1 (!%p273_p2), %v3140_v0  ;;  %v3141_v41 = vld [vmem:[%s4313_s4] sm:$0xff] (!%p273_p2)   ;;  %v3144_v44 = vld [vmem:[%s4315_s6 + $0x8] sm:$0xff] (!%p273_p2)   ;;  %v3145_v45 = vld [vmem:[%s4315_s6 + $0x10] sm:$0xff] (!%p273_p2)  }
   0x8   : > { %v3143_v43 = vld [vmem:[%s4315_s6] sm:$0xff] (!%p273_p2)   ;;  %v3146_v46 = vld [vmem:[%s4315_s6 + $0x18] sm:$0xff] (!%p273_p2)   ;;  %v3148_v48 = vld [vmem:[%s4315_s6 + $0x28] sm:$0xff] (!%p273_p2)  }
   0x9   : > { %v3147_v47 = vld [vmem:[%s4315_s6 + $0x20] sm:$0xff] (!%p273_p2)  }
   0xd   : > { %s4319_s28 = smov (!%p309_p3, %s2650_s28), 1 }
   0xe   : > { %s3131_s9 = smul.u32 48, %s4319_s28  ;;  %s321_s26 = scalar_lea.vmem %s4317_s8, %s4319_s28 }
  0x10   : > { %s313_s12 = scalar_lea.vmem %s4309_s0, %s3131_s9  ;;  %s318_s15 = scalar_lea.vmem %s4310_s1, %s3131_s9 }
  0x11   : > { %v323_v1 = vld [vmem:[%s313_s12] sm:$0xff]  ;;  %v324_v2 = vld [vmem:[%s313_s12 + $0x8] sm:$0xff]  ;;  %v325_v3 = vld [vmem:[%s313_s12 + $0x10] sm:$0xff] }
  0x12   : > { %v335_v4 = vpack.c.bf16 %v324_v2, %v323_v1  ;;  %v326_v5 = vld [vmem:[%s313_s12 + $0x18] sm:$0xff]  ;;  %v327_v6 = vld [vmem:[%s313_s12 + $0x20] sm:$0xff]  ;;  %v328_v7 = vld [vmem:[%s313_s12 + $0x28] sm:$0xff] }
  0x13   : > { %v336_v8 = vpack.c.bf16 %v326_v5, %v325_v3  ;;  %v337_v9 = vpack.c.bf16 %v328_v7, %v327_v6  ;;  %v329_v10 = vld [vmem:[%s318_s15] sm:$0xff]  ;;  %v330_v11 = vld [vmem:[%s318_s15 + $0x8] sm:$0xff]  ;;  %v331_v12 = vld [vmem:[%s318_s15 + $0x10] sm:$0xff] }
  0x14   : > { %2885 = vmatprep.mubr.msk.bf16.mxu0 %vm349_vm0, %v335_v4  ;;  %v338_v13 = vpack.c.bf16 %v330_v11, %v329_v10  ;;  %v332_v14 = vld [vmem:[%s318_s15 + $0x18] sm:$0xff]  ;;  %v333_v16 = vld [vmem:[%s318_s15 + $0x20] sm:$0xff]  ;;  %v334_v17 = vld [vmem:[%s318_s15 + $0x28] sm:$0xff] }
  0x15   : > { %2886 = vmatmul.mubr.msk.bf16.vlgmr.msra.gmra.mrb[0].mxu0 %vm349_vm0, %v336_v8  ;;  %2889 = vmatprep.mubr.msk.bf16.mxu1 %vm349_vm0, %v337_v9  ;;  %v339_v15 = vpack.c.bf16 %v332_v14, %v331_v12  ;;  %v340_v18 = vpack.c.bf16 %v334_v17, %v333_v16 }
  0x16   : > { %2890 = vmatmul.mubr.msk.bf16.vlgmr.msra.gmra.mrb[0].mxu1 %vm349_vm0, %v338_v13  ;;  %2931 = vmatprep.mubr.msk.f32.mxu0 %vm349_vm0, %v449_v19 }
  0x17   : > { %2893 = vmatprep.mubr.msk.bf16.mxu1 %vm349_vm0, %v339_v15 }
  0x1e   : > { %2894 = vmatmul.mubr.msk.bf16.gmra.mrb[4].mxu1 %vm349_vm0, %v340_v18 }
  0x1f   : > { %2901 = vmatprep.mubr.msk.f32.mxu1 %vm349_vm0, %v449_v19 }
  0xe8   : > { %v2887_v20 = vpop.f32.mrb[0].mxu0 }
  0xe9   : > { %v402_v21 = vpop.f32.mrb[1].mxu0  ;;  %v2891_v22 = vpop.f32.mrb[0].mxu1 }
  0xea   : > { %v2888_v23 = vpop.f32.mrb[2].mxu0  ;;  %v418_v24 = vpop.f32.mrb[1].mxu1 }
  0xeb   : > { %v3109_v25 = vpack.c.bf16 %v2888_v23, %v2887_v20  ;;  %v405_v26 = vpop.f32.mrb[3].mxu0  ;;  %v2892_v27 = vpop.f32.mrb[2].mxu1 }
  0xec   : > { %v3105_v28 = vpack.c.bf16 %v405_v26, %v402_v21  ;;  %v3117_v29 = vpack.c.bf16 %v2892_v27, %v2891_v22  ;;  %v421_v30 = vpop.f32.mrb[3].mxu1  ;;  %v3149_v21 = vld [vmem:[%s4315_s6 + $0x30] sm:$0xff]   ;;  %v3150_v22 = vld [vmem:[%s4315_s6 + $0x38] sm:$0xff]  }
  0xed   : > { %v3113_v31 = vpack.c.bf16 %v421_v30, %v418_v24  ;;  %v3471_v24 = vld [vmem:[%s4314_s5] ss:$0 sm:$0xff] }
  0xee   : > { %3106 = vmatprep.subr.bf16.mxu1 %v3105_v28  ;;  %3118 = vmatprep.subr.bf16.mxu0 %v3117_v29 }
  0xef   : > { %3108 = vmatpush3.bf16.msra.mxu1 %v3105_v28  ;;  %3120 = vmatpush3.bf16.msra.mxu0 %v3117_v29 }
  0xf0   : > { %3110 = vmatprep.subr.bf16.mxu1 %v3109_v25 }
  0xf1   : > { %v2895_v34 = vpop.f32.mrb[4].mxu1 }
  0xf2   : > { %2902 = vmatmul.mubr.msk.f32.vlgmr.msra.gmra.mrb[8].mxu1 %vm349_vm0, %v450_v32  ;;  %v434_v35 = vpop.f32.mrb[5].mxu1  ;;  %2932 = vmatmul.mubr.msk.f32.vlgmr.msra.gmra.mrb[4].mxu0 %vm349_vm0, %v450_v32 }
  0xf3   : > { %3112 = vmatpush3.bf16.msra.mxu1 %v3109_v25  ;;  %2904 = vmatprep.mubr.msk.f32.mxu1 %vm349_vm0, %v451_v33  ;;  %v2896_v37 = vpop.f32.mrb[6].mxu1 }
  0xf4   : > { %3114 = vmatprep.subr.bf16.mxu1 %v3113_v31  ;;  %v3125_v38 = vpack.c.bf16 %v2896_v37, %v2895_v34  ;;  %v437_v39 = vpop.f32.mrb[7].mxu1  ;;  %2934 = vmatprep.mubr.msk.f32.mxu0 %vm349_vm0, %v451_v33 }
  0xf5   : > { %v3121_v40 = vpack.c.bf16 %v437_v39, %v434_v35 }
  0xf6   : > { %2905 = vmatmul.mubr.msk.f32.gmra.mrb[10].mxu1 %vm349_vm0, %v452_v36  ;;  %2935 = vmatmul.mubr.msk.f32.gmra.mrb[6].mxu0 %vm349_vm0, %v452_v36 }
  0xf7   : > { %2911 = vmatprep.mubr.msk.f32.mxu1 %vm349_vm0, %v449_v19  ;;  %3126 = vmatprep.subr.bf16.mxu0 %v3125_v38 }
  0xf8   : > { %3128 = vmatpush3.bf16.msra.mxu0 %v3125_v38  ;;  %2951 = vmatprep.mubr.msk.f32.mxu0 %vm349_vm0, %v449_v19 }
  0xf9   : > { %2985 = vmatprep.subr.bf16.mxu0 %v3143_v43 }
  0xfa   : > { %2912 = vmatmul.mubr.msk.f32.vlgmr.msra.gmra.mrb[12].mxu1 %vm349_vm0, %v450_v32 }
  0xfb   : > { %2914 = vmatprep.mubr.msk.f32.mxu1 %vm349_vm0, %v451_v33  ;;  %3116 = vmatpush3.bf16.msra.mxu1 %v3113_v31 }
  0xfc   : > { %3122 = vmatprep.subr.bf16.mxu1 %v3121_v40  ;;  %2952 = vmatmul.mubr.msk.f32.vlgmr.msra.gmra.mrb[8].mxu0 %vm349_vm0, %v450_v32 }
  0xfd   : > { %2954 = vmatprep.mubr.msk.f32.mxu0 %vm349_vm0, %v451_v33  ;;  %2986 = vmatpush3.bf16.msra.mxu0 %v3143_v43 }
  0xfe   : > { %2915 = vmatmul.mubr.msk.f32.gmra.mrb[14].mxu1 %vm349_vm0, %v452_v36  ;;  %2987 = vmatprep.subr.bf16.mxu0 %v3144_v44 }
  0xff   : > { %2921 = vmatprep.mubr.msk.f32.mxu1 %vm349_vm0, %v449_v19 }
 0x100   : > { %2955 = vmatmul.mubr.msk.f32.gmra.mrb[10].mxu0 %vm349_vm0, %v452_v36 }
 0x101   : > { %2988 = vmatpush3.bf16.msra.mxu0 %v3144_v44 }
 0x102   : > { %2922 = vmatmul.mubr.msk.f32.vlgmr.msra.gmra.mrb[16].mxu1 %vm349_vm0, %v450_v32  ;;  %2989 = vmatprep.subr.bf16.mxu0 %v3145_v45 }
 0x103   : > { %2924 = vmatprep.mubr.msk.f32.mxu1 %vm349_vm0, %v451_v33  ;;  %3124 = vmatpush3.bf16.msra.mxu1 %v3121_v40 }
 0x104   : > { %2957 = vmatprep.subr.bf16.mxu1 %v3141_v41 }
 0x105   : > { %2990 = vmatpush3.bf16.msra.mxu0 %v3145_v45 }
 0x106   : > { %2925 = vmatmul.mubr.msk.f32.gmra.mrb[18].mxu1 %vm349_vm0, %v452_v36  ;;  %2991 = vmatprep.subr.bf16.mxu0 %v3146_v46 }
 0x107   : > { %2941 = vmatprep.mubr.msk.f32.mxu1 %vm349_vm0, %v449_v19 }
 0x109   : > { %2992 = vmatpush3.bf16.msra.mxu0 %v3146_v46 }
 0x10a   : > { %2942 = vmatmul.mubr.msk.f32.vlgmr.msra.gmra.mrb[20].mxu1 %vm349_vm0, %v450_v32  ;;  %2993 = vmatprep.subr.bf16.mxu0 %v3147_v47 }
 0x10b   : > { %2944 = vmatprep.mubr.msk.f32.mxu1 %vm349_vm0, %v451_v33  ;;  %2958 = vmatpush3.bf16.msra.mxu1 %v3141_v41 }
 0x10c   : > { %2959 = vmatprep.subr.bf16.mxu1 %v3142_v42 }
 0x10d   : > { %2994 = vmatpush3.bf16.msra.mxu0 %v3147_v47 }
 0x10e   : > { %2945 = vmatmul.mubr.msk.f32.gmra.mrb[22].mxu1 %vm349_vm0, %v452_v36  ;;  %2995 = vmatprep.subr.bf16.mxu0 %v3148_v48 }
 0x10f   : > { %2960 = vmatpush3.bf16.msra.mxu1 %v3142_v42 }
 0x111   : > { %2996 = vmatpush3.bf16.msra.mxu0 %v3148_v48 }
 0x112   : > { %2997 = vmatprep.subr.bf16.mxu0 %v3149_v21 }
 0x115   : > { %2998 = vmatpush3.bf16.msra.mxu0 %v3149_v21  ;;  %v3152_v21 = vld [vmem:[%s4315_s6 + $0x48] sm:$0xff]  }
 0x116   : > { %2999 = vmatprep.subr.bf16.mxu0 %v3150_v22 }
 0x119   : > { %3000 = vmatpush3.bf16.msra.mxu0 %v3150_v22  ;;  %v3153_v22 = vld [vmem:[%s4315_s6 + $0x50] sm:$0xff]  }
 0x1c5   : > { %v2903_v49 = vpop.f32.mrb[8].mxu1  ;;  %v2933_v50 = vpop.f32.mrb[4].mxu0 }
 0x1c6   : > { %v531_v51 = vpop.f32.mrb[9].mxu1  ;;  %v786_v52 = vpop.f32.mrb[5].mxu0 }
 0x1c7   : > { %v975_v53 = vpack.c.bf16 %v2903_v49, %v531_v51  ;;  %v981_v54 = vpack.c.bf16 %v2933_v50, %v786_v52 }
 0x1c9   : > { %v2906_v55 = vpop.f32.mrb[10].mxu1  ;;  %2961 = vmatprep.mubr.msk.bf16.mxu1 %vm1010_vm1, %v975_v53  ;;  %v2936_v56 = vpop.f32.mrb[6].mxu0 }
 0x1ca   : > { %v541_v57 = vpop.f32.mrb[11].mxu1  ;;  %v796_v58 = vpop.f32.mrb[7].mxu0 }
 0x1cb   : > { %v976_v59 = vpack.c.bf16 %v2906_v55, %v541_v57  ;;  %v982_v60 = vpack.c.bf16 %v2936_v56, %v796_v58 }
 0x1cd   : > { %2962 = vmatmul.mubr.msk.bf16.vlgmr.msra.gmra.mrb[24].mxu1 %vm1010_vm1, %v976_v59  ;;  %v2913_v61 = vpop.f32.mrb[12].mxu1 }
 0x1ce   : > { %v616_v62 = vpop.f32.mrb[13].mxu1 }
 0x1cf   : > { %v977_v63 = vpack.c.bf16 %v2913_v61, %v616_v62  ;;  %v2953_v0 = vpop.f32.mrb[8].mxu0 }
 0x1d0   : > { %v956_v1 = vpop.f32.mrb[9].mxu0 }
 0x1d1   : > { %v2916_v2 = vpop.f32.mrb[14].mxu1  ;;  %2965 = vmatprep.mubr.msk.bf16.mxu1 %vm1010_vm1, %v977_v63  ;;  %v985_v3 = vpack.c.bf16 %v2953_v0, %v956_v1 }
 0x1d2   : > { %v626_v4 = vpop.f32.mrb[15].mxu1 }
 0x1d3   : > { %v978_v5 = vpack.c.bf16 %v2916_v2, %v626_v4  ;;  %v2956_v6 = vpop.f32.mrb[10].mxu0 }
 0x1d4   : > { %v966_v7 = vpop.f32.mrb[11].mxu0 }
 0x1d5   : > { %2966 = vmatmul.mubr.msk.bf16.gmra.mrb[28].mxu1 %vm1010_vm1, %v978_v5  ;;  %v2923_v8 = vpop.f32.mrb[16].mxu1  ;;  %v986_v9 = vpack.c.bf16 %v2956_v6, %v966_v7 }
 0x1d6   : > { %v701_v10 = vpop.f32.mrb[17].mxu1 }
 0x1d7   : > { %v979_v11 = vpack.c.bf16 %v2923_v8, %v701_v10 }
 0x1d9   : > { %v2926_v12 = vpop.f32.mrb[18].mxu1  ;;  %2969 = vmatprep.mubr.msk.bf16.mxu1 %vm1010_vm1, %v979_v11 }
 0x1da   : > { %v711_v13 = vpop.f32.mrb[19].mxu1 }
 0x1db   : > { %v980_v14 = vpack.c.bf16 %v2926_v12, %v711_v13 }
 0x1dd   : > { %2970 = vmatmul.mubr.msk.bf16.gmra.mrb[32].mxu1 %vm1010_vm1, %v980_v14  ;;  %v2943_v15 = vpop.f32.mrb[20].mxu1 }
 0x1de   : > { %2973 = vmatprep.mubr.msk.bf16.mxu1 %vm1010_vm1, %v981_v54  ;;  %v871_v16 = vpop.f32.mrb[21].mxu1 }
 0x1df   : > { %v983_v17 = vpack.c.bf16 %v2943_v15, %v871_v16 }
 0x1e1   : > { %v2946_v18 = vpop.f32.mrb[22].mxu1 }
 0x1e2   : > { %v881_v19 = vpop.f32.mrb[23].mxu1 }
 0x1e3   : > { %v984_v20 = vpack.c.bf16 %v2946_v18, %v881_v19 }
 0x1e5   : > { %2974 = vmatmul.mubr.msk.bf16.gmra.mrb[36].mxu1 %vm1010_vm1, %v982_v60 }
 0x1e6   : > { %2977 = vmatprep.mubr.msk.bf16.mxu1 %vm1010_vm1, %v983_v17 }
 0x1ed   : > { %2978 = vmatmul.mubr.msk.bf16.gmra.mrb[40].mxu1 %vm1010_vm1, %v984_v20  ;;  %v3151_v20 = vld [vmem:[%s4315_s6 + $0x40] sm:$0xff]  }
 0x1ee   : > { %2981 = vmatprep.mubr.msk.bf16.mxu1 %vm1010_vm1, %v985_v3  ;;  %3025 = vmatprep.subr.bf16.mxu1 %v3151_v20 }
 0x1ef   : > { %3026 = vmatpush3.bf16.msra.mxu1 %v3151_v20 }
 0x1f0   : > { %3027 = vmatprep.subr.bf16.mxu1 %v3152_v21 }
 0x1f3   : > { %3028 = vmatpush3.bf16.msra.mxu1 %v3152_v21 }
 0x1f4   : > { %3029 = vmatprep.subr.bf16.mxu1 %v3153_v22 }
 0x1f5   : > { %2982 = vmatmul.mubr.msk.bf16.gmra.mrb[44].mxu1 %vm1010_vm1, %v986_v9 }
 0x1f7   : > { %3030 = vmatpush3.bf16.msra.mxu1 %v3153_v22 }
 0x2a0   : > { %v2963_v23 = vpop.f32.mrb[24].mxu1 }
 0x2a1   : > { %v1081_v25 = vpop.f32.mrb[25].mxu1  ;;  %v1090_v27 = vadd.f32 %v2963_v23, %v3471_v24  ;;  %v3154_v23 = vld [vmem:[%s4315_s6 + $0x58] sm:$0xff]  }
 0x2a2   : > { %v2964_v26 = vpop.f32.mrb[26].mxu1  ;;  %v1082_v30 = vadd.f32 %v3471_v24, %v1081_v25  ;;  %3031 = vmatprep.subr.bf16.mxu1 %v3154_v23  ;;  %v3156_v25 = vld [vmem:[%s4315_s6 + $0x68] sm:$0xff]  }
 0x2a3   : > { %v1093_v28 = vadd.f32 %v2964_v26, %v3471_v24  ;;  %v1084_v29 = vpop.f32.mrb[27].mxu1  ;;  %3032 = vmatpush3.bf16.msra.mxu1 %v3154_v23  ;;  %v3157_v26 = vld [vmem:[%s4315_s6 + $0x70] sm:$0xff]  }
 0x2a4   : > { %v1085_v31 = vadd.f32 %v3471_v24, %v1084_v29 }
 0x2a5   : > { %v1177_v32 = vpack.c.bf16 %v1093_v28, %v1090_v27  ;;  %v3158_v27 = vld [vmem:[%s4315_s6 + $0x78] sm:$0xff]   ;;  %v3524_v28 = vld [vmem:[%s4316_s7] ss:$0 sm:$0xff] }
 0x2a6   : > { %v1176_v33 = vpack.c.bf16 %v1085_v31, %v1082_v30 }
 0x2a8   : > { %v2967_v34 = vpop.f32.mrb[28].mxu1  ;;  %3001 = vmatprep.mubr.bf16.mxu0 %v1176_v33 }
 0x2a9   : > { %v1097_v35 = vpop.f32.mrb[29].mxu1  ;;  %3002 = vmatmul.mubr.bf16.vlgmr.msra.gmra.mrb[12].mxu0 %v1177_v32  ;;  %v1106_v37 = vadd.f32 %v2967_v34, %v3471_v24 }
 0x2aa   : > { %v2968_v36 = vpop.f32.mrb[30].mxu1  ;;  %v1098_v40 = vadd.f32 %v3471_v24, %v1097_v35 }
 0x2ab   : > { %v1109_v38 = vadd.f32 %v2968_v36, %v3471_v24  ;;  %v1100_v39 = vpop.f32.mrb[31].mxu1 }
 0x2ac   : > { %v1101_v41 = vadd.f32 %v3471_v24, %v1100_v39 }
 0x2ad   : > { %v1179_v42 = vpack.c.bf16 %v1109_v38, %v1106_v37 }
 0x2ae   : > { %v1178_v43 = vpack.c.bf16 %v1101_v41, %v1098_v40 }
 0x2b0   : > { %v2971_v44 = vpop.f32.mrb[32].mxu1  ;;  %3005 = vmatprep.mubr.bf16.mxu0 %v1178_v43 }
 0x2b1   : > { %v1113_v45 = vpop.f32.mrb[33].mxu1  ;;  %3006 = vmatmul.mubr.bf16.gmra.mrb[16].mxu0 %v1179_v42  ;;  %v1122_v47 = vadd.f32 %v2971_v44, %v3471_v24 }
 0x2b2   : > { %v2972_v46 = vpop.f32.mrb[34].mxu1  ;;  %v1114_v50 = vadd.f32 %v3471_v24, %v1113_v45 }
 0x2b3   : > { %v1125_v48 = vadd.f32 %v2972_v46, %v3471_v24  ;;  %v1116_v49 = vpop.f32.mrb[35].mxu1 }
 0x2b4   : > { %v1117_v51 = vadd.f32 %v3471_v24, %v1116_v49 }
 0x2b5   : > { %v1181_v52 = vpack.c.bf16 %v1125_v48, %v1122_v47 }
 0x2b6   : > { %v1180_v53 = vpack.c.bf16 %v1117_v51, %v1114_v50 }
 0x2b8   : > { %v2975_v54 = vpop.f32.mrb[36].mxu1  ;;  %3009 = vmatprep.mubr.bf16.mxu0 %v1180_v53 }
 0x2b9   : > { %v1129_v55 = vpop.f32.mrb[37].mxu1  ;;  %3010 = vmatmul.mubr.bf16.gmra.mrb[20].mxu0 %v1181_v52  ;;  %v1138_v57 = vadd.f32 %v2975_v54, %v3471_v24 }
 0x2ba   : > { %v2976_v56 = vpop.f32.mrb[38].mxu1  ;;  %v1130_v60 = vadd.f32 %v3471_v24, %v1129_v55 }
 0x2bb   : > { %v1141_v58 = vadd.f32 %v2976_v56, %v3471_v24  ;;  %v1132_v59 = vpop.f32.mrb[39].mxu1 }
 0x2bc   : > { %v1133_v61 = vadd.f32 %v3471_v24, %v1132_v59 }
 0x2bd   : > { %v1183_v62 = vpack.c.bf16 %v1141_v58, %v1138_v57 }
 0x2be   : > { %v1182_v63 = vpack.c.bf16 %v1133_v61, %v1130_v60 }
 0x2c0   : > { %v2979_v0 = vpop.f32.mrb[40].mxu1  ;;  %3013 = vmatprep.mubr.bf16.mxu0 %v1182_v63 }
 0x2c1   : > { %v1145_v1 = vpop.f32.mrb[41].mxu1  ;;  %3014 = vmatmul.mubr.bf16.gmra.mrb[24].mxu0 %v1183_v62  ;;  %v1154_v3 = vadd.f32 %v2979_v0, %v3471_v24 }
 0x2c2   : > { %v2980_v2 = vpop.f32.mrb[42].mxu1  ;;  %v1146_v6 = vadd.f32 %v3471_v24, %v1145_v1 }
 0x2c3   : > { %v1157_v4 = vadd.f32 %v2980_v2, %v3471_v24  ;;  %v1148_v5 = vpop.f32.mrb[43].mxu1 }
 0x2c4   : > { %v1149_v7 = vadd.f32 %v3471_v24, %v1148_v5 }
 0x2c5   : > { %v1185_v8 = vpack.c.bf16 %v1157_v4, %v1154_v3 }
 0x2c6   : > { %v1184_v9 = vpack.c.bf16 %v1149_v7, %v1146_v6 }
 0x2c8   : > { %v2983_v10 = vpop.f32.mrb[44].mxu1  ;;  %3017 = vmatprep.mubr.bf16.mxu0 %v1184_v9 }
 0x2c9   : > { %v1161_v11 = vpop.f32.mrb[45].mxu1  ;;  %3018 = vmatmul.mubr.bf16.gmra.mrb[28].mxu0 %v1185_v8  ;;  %v1170_v13 = vadd.f32 %v2983_v10, %v3471_v24 }
 0x2ca   : > { %v2984_v12 = vpop.f32.mrb[46].mxu1  ;;  %v1162_v16 = vadd.f32 %v3471_v24, %v1161_v11 }
 0x2cb   : > { %v1173_v14 = vadd.f32 %v2984_v12, %v3471_v24  ;;  %v1164_v15 = vpop.f32.mrb[47].mxu1 }
 0x2cc   : > { %v1165_v17 = vadd.f32 %v3471_v24, %v1164_v15  ;;  %v3155_v24 = vld [vmem:[%s4315_s6 + $0x60] sm:$0xff]  }
 0x2cd   : > { %v1187_v18 = vpack.c.bf16 %v1173_v14, %v1170_v13  ;;  %3033 = vmatprep.subr.bf16.mxu1 %v3155_v24 }
 0x2ce   : > { %v1186_v19 = vpack.c.bf16 %v1165_v17, %v1162_v16  ;;  %3034 = vmatpush3.bf16.msra.mxu1 %v3155_v24 }
 0x2cf   : > { %3035 = vmatprep.subr.bf16.mxu1 %v3156_v25 }
 0x2d0   : > { %3021 = vmatprep.mubr.bf16.mxu0 %v1186_v19 }
 0x2d1   : > { %3022 = vmatmul.mubr.bf16.gmra.mrb[32].mxu0 %v1187_v18 }
 0x2d2   : > { %3036 = vmatpush3.bf16.msra.mxu1 %v3156_v25 }
 0x2d3   : > { %3037 = vmatprep.subr.bf16.mxu1 %v3157_v26 }
 0x2d6   : > { %3038 = vmatpush3.bf16.msra.mxu1 %v3157_v26 }
 0x2d7   : > { %3039 = vmatprep.subr.bf16.mxu1 %v3158_v27 }
 0x2da   : > { %3040 = vmatpush3.bf16.msra.mxu1 %v3158_v27 }
 0x37c   : > { %v3003_v29 = vpop.f32.mrb[12].mxu0 }
 0x37d   : > { %v3527_v30 = vadd.f32 %v3003_v29, %v3524_v28  ;;  %v1293_v31 = vpop.f32.mrb[13].mxu0 }
 0x37e   : > { %v3530_v32 = vadd.f32 %v3524_v28, %v1293_v31  ;;  %v3004_v33 = vpop.f32.mrb[14].mxu0 }
 0x37f   : > { %v1390_v34 = vmul.f32 %v3527_v30, %v3527_v30  ;;  %v3535_v35 = vadd.f32 %v3004_v33, %v3524_v28  ;;  %v1296_v36 = vpop.f32.mrb[15].mxu0 }
 0x380   : > { %v1388_v37 = vmul.f32 %v3530_v32, %v3530_v32  ;;  %v3540_v38 = vadd.f32 %v3524_v28, %v1296_v36 }
 0x381   : > { %v1414_v39 = vmul.f32 %v1390_v34, %v3527_v30  ;;  %v1391_v40 = vmul.f32 %v3535_v35, %v3535_v35 }
 0x382   : > { %v1412_v41 = vmul.f32 %v1388_v37, %v3530_v32  ;;  %v1389_v42 = vmul.f32 %v3540_v38, %v3540_v38 }
 0x383   : > { %v1438_v43 = vmul.f32 0.044715, %v1414_v39  ;;  %v1415_v44 = vmul.f32 %v1391_v40, %v3535_v35 }
 0x384   : > { %v1436_v45 = vmul.f32 0.044715, %v1412_v41  ;;  %v1413_v46 = vmul.f32 %v1389_v42, %v3540_v38  ;;  %v3007_v47 = vpop.f32.mrb[16].mxu0 }
 0x385   : > { %v1462_v48 = vadd.f32 %v1438_v43, %v3527_v30  ;;  %v1439_v49 = vmul.f32 0.044715, %v1415_v44  ;;  %v3552_v50 = vadd.f32 %v3007_v47, %v3524_v28  ;;  %v1309_v51 = vpop.f32.mrb[17].mxu0 }
 0x386   : > { %v1460_v52 = vadd.f32 %v1436_v45, %v3530_v32  ;;  %v1437_v53 = vmul.f32 0.044715, %v1413_v46  ;;  %v3556_v54 = vadd.f32 %v3524_v28, %v1309_v51  ;;  %v3008_v55 = vpop.f32.mrb[18].mxu0 }
 0x387   : > { %v1486_v56 = vmul.f32 0.7978846, %v1462_v48  ;;  %v1463_v57 = vadd.f32 %v1439_v49, %v3535_v35  ;;  %v1394_v58 = vmul.f32 %v3552_v50, %v3552_v50  ;;  %v3562_v59 = vadd.f32 %v3008_v55, %v3524_v28  ;;  %v1312_v60 = vpop.f32.mrb[19].mxu0 }
 0x388   : > { %v1484_v61 = vmul.f32 0.7978846, %v1460_v52  ;;  %v1461_v62 = vadd.f32 %v1437_v53, %v3540_v38  ;;  %v1392_v63 = vmul.f32 %v3556_v54, %v3556_v54  ;;  %v3568_v0 = vadd.f32 %v3524_v28, %v1312_v60 }
 0x389   : > { %3167 = vtanh.f32 %v1486_v56  ;;  %v1487_v1 = vmul.f32 0.7978846, %v1463_v57  ;;  %v1418_v2 = vmul.f32 %v1394_v58, %v3552_v50  ;;  %v1395_v3 = vmul.f32 %v3562_v59, %v3562_v59 }
 0x38a   : > { %3169 = vtanh.f32 %v1484_v61  ;;  %v1485_v4 = vmul.f32 0.7978846, %v1461_v62  ;;  %v1416_v5 = vmul.f32 %v1392_v63, %v3556_v54  ;;  %v1393_v6 = vmul.f32 %v3568_v0, %v3568_v0 }
 0x38b   : > { %3171 = vtanh.f32 %v1487_v1  ;;  %v1442_v7 = vmul.f32 0.044715, %v1418_v2  ;;  %v1419_v8 = vmul.f32 %v1395_v3, %v3562_v59 }
 0x38c   : > { %v1440_v9 = vmul.f32 0.044715, %v1416_v5  ;;  %v1417_v10 = vmul.f32 %v1393_v6, %v3568_v0  ;;  %v3011_v11 = vpop.f32.mrb[20].mxu0  ;;  %3173 = vtanh.f32 %v1485_v4 }
 0x38d   : > { %v1466_v12 = vadd.f32 %v1442_v7, %v3552_v50  ;;  %v1443_v13 = vmul.f32 0.044715, %v1419_v8  ;;  %v3580_v14 = vadd.f32 %v3011_v11, %v3524_v28  ;;  %v1325_v15 = vpop.f32.mrb[21].mxu0 }
 0x38e   : > { %v1464_v16 = vadd.f32 %v1440_v9, %v3556_v54  ;;  %v1441_v17 = vmul.f32 0.044715, %v1417_v10  ;;  %v3584_v18 = vadd.f32 %v3524_v28, %v1325_v15  ;;  %v3012_v19 = vpop.f32.mrb[22].mxu0 }
 0x38f   : > { %v1490_v20 = vmul.f32 0.7978846, %v1466_v12  ;;  %v1467_v21 = vadd.f32 %v1443_v13, %v3562_v59  ;;  %v1398_v22 = vmul.f32 %v3580_v14, %v3580_v14  ;;  %v3590_v23 = vadd.f32 %v3012_v19, %v3524_v28  ;;  %v1328_v24 = vpop.f32.mrb[23].mxu0 }
 0x390   : > { %v1488_v25 = vmul.f32 0.7978846, %v1464_v16  ;;  %v1465_v26 = vadd.f32 %v1441_v17, %v3568_v0  ;;  %v1396_v27 = vmul.f32 %v3584_v18, %v3584_v18  ;;  %v3596_v29 = vadd.f32 %v3524_v28, %v1328_v24 }
 0x391   : > { %v1491_v31 = vmul.f32 0.7978846, %v1467_v21  ;;  %v1422_v33 = vmul.f32 %v1398_v22, %v3580_v14  ;;  %v1399_v34 = vmul.f32 %v3590_v23, %v3590_v23  ;;  %3175 = vtanh.f32 %v1490_v20 }
 0x392   : > { %v1489_v36 = vmul.f32 0.7978846, %v1465_v26  ;;  %v1420_v37 = vmul.f32 %v1396_v27, %v3584_v18  ;;  %v1397_v39 = vmul.f32 %v3596_v29, %v3596_v29  ;;  %3177 = vtanh.f32 %v1488_v25 }
 0x393   : > { %v3168_v40 = vpop.eup %3167  ;;  %v1446_v41 = vmul.f32 0.044715, %v1422_v33  ;;  %v1423_v42 = vmul.f32 %v1399_v34, %v3590_v23  ;;  %3179 = vtanh.f32 %v1491_v31 }
 0x394   : > { %v3170_v43 = vpop.eup %3169  ;;  %v1534_v44 = vadd.f32 1.0, %v3168_v40  ;;  %v1444_v45 = vmul.f32 0.044715, %v1420_v37  ;;  %v1421_v46 = vmul.f32 %v1397_v39, %v3596_v29  ;;  %v3015_v47 = vpop.f32.mrb[24].mxu0  ;;  %3181 = vtanh.f32 %v1489_v36 }
 0x395   : > { %v3172_v48 = vpop.eup %3171  ;;  %v1470_v49 = vadd.f32 %v1446_v41, %v3580_v14  ;;  %v1447_v51 = vmul.f32 0.044715, %v1423_v42  ;;  %v3608_v52 = vadd.f32 %v3015_v47, %v3524_v28  ;;  %v1341_v53 = vpop.f32.mrb[25].mxu0  ;;  %v1532_v7 = vadd.f32 1.0, %v3170_v43 }
 0x396   : > { %v1558_v55 = vmul.f32 0.5, %v1534_v44  ;;  %v1535_v56 = vadd.f32 1.0, %v3172_v48  ;;  %v1468_v57 = vadd.f32 %v1444_v45, %v3584_v18  ;;  %v1445_v58 = vmul.f32 0.044715, %v1421_v46  ;;  %v3016_v60 = vpop.f32.mrb[26].mxu0  ;;  %v3174_v3 = vpop.eup %3173 }
 0x397   : > { %v1494_v61 = vmul.f32 0.7978846, %v1470_v49  ;;  %v1471_v62 = vadd.f32 %v1447_v51, %v3590_v23  ;;  %v1402_v63 = vmul.f32 %v3608_v52, %v3608_v52  ;;  %v3615_v1 = vadd.f32 %v3524_v28, %v1341_v53  ;;  %v1344_v2 = vpop.f32.mrb[27].mxu0 }
 0x398   : > { %v1559_v4 = vmul.f32 0.5, %v1535_v56  ;;  %v1492_v5 = vmul.f32 0.7978846, %v1468_v57  ;;  %v1469_v6 = vadd.f32 %v1445_v58, %v3596_v29  ;;  %v3619_v8 = vmul.f32 %v1558_v55, %v3527_v30 }
 0x399   : > { %v1495_v9 = vmul.f32 0.7978846, %v1471_v62  ;;  %v1426_v10 = vmul.f32 %v1402_v63, %v3608_v52  ;;  %v1400_v11 = vmul.f32 %v3615_v1, %v3615_v1  ;;  %3183 = vtanh.f32 %v1494_v61 }
 0x39a   : > { %v3625_v12 = vmul.f32 %v1559_v4, %v3535_v35  ;;  %v1493_v13 = vmul.f32 0.7978846, %v1469_v6  ;;  %v3628_v15 = vadd.f32 %v3016_v60, %v3524_v28  ;;  %3185 = vtanh.f32 %v1492_v5 }
 0x39b   : > { %v1450_v16 = vmul.f32 0.044715, %v1426_v10  ;;  %v1424_v17 = vmul.f32 %v1400_v11, %v3615_v1  ;;  %v3632_v30 = vadd.f32 %v3524_v28, %v1344_v2  ;;  %v3634_v19 = vpop.eup %3175  ;;  %3187 = vtanh.f32 %v1495_v9 }
 0x39c   : > { %v1647_v20 = vpack.c.bf16 %v3625_v12, %v3619_v8  ;;  %v1403_v35 = vmul.f32 %v3628_v15, %v3628_v15  ;;  %v3019_v21 = vpop.f32.mrb[28].mxu0  ;;  %v1533_v22 = vadd.f32 1.0, %v3174_v3  ;;  %v3640_v24 = vpop.eup %3177  ;;  %3189 = vtanh.f32 %v1493_v13 }
 0x39d   : > { %v1474_v25 = vadd.f32 %v1450_v16, %v3608_v52  ;;  %v1448_v26 = vmul.f32 0.044715, %v1424_v17  ;;  %v1401_v27 = vmul.f32 %v3632_v30, %v3632_v30  ;;  %v3646_v31 = vadd.f32 %v3019_v21, %v3524_v28  ;;  %v1357_v33 = vpop.f32.mrb[29].mxu0  ;;  %v3648_v34 = vpop.eup %3179 }
 0x39e   : > { %v1427_v36 = vmul.f32 %v1403_v35, %v3628_v15  ;;  %v3652_v37 = vadd.f32 %v3524_v28, %v1357_v33  ;;  %v3020_v39 = vpop.f32.mrb[30].mxu0  ;;  %v1556_v40 = vmul.f32 0.5, %v1532_v7  ;;  %v3654_v41 = vpop.eup %3181  ;;  %v1557_v57 = vmul.f32 0.5, %v1533_v22 }
 0x39f   : > { %v1498_v42 = vmul.f32 0.7978846, %v1474_v25  ;;  %v1472_v43 = vadd.f32 %v1448_v26, %v3615_v1  ;;  %v1425_v44 = vmul.f32 %v1401_v27, %v3632_v30  ;;  %v1406_v45 = vmul.f32 %v3646_v31, %v3646_v31  ;;  %v1360_v46 = vpop.f32.mrb[31].mxu0 }
 0x3a0   : > { %v1451_v47 = vmul.f32 0.044715, %v1427_v36  ;;  %v1404_v48 = vmul.f32 %v3652_v37, %v3652_v37  ;;  %v3663_v49 = vadd.f32 %v3020_v39, %v3524_v28  ;;  %v3666_v51 = vadd.f32 %v3524_v28, %v1360_v46 }
 0x3a1   : > { %v1496_v53 = vmul.f32 0.7978846, %v1472_v43  ;;  %v1449_v55 = vmul.f32 0.044715, %v1425_v44  ;;  %v1430_v56 = vmul.f32 %v1406_v45, %v3646_v31  ;;  %3191 = vtanh.f32 %v1498_v42 }
 0x3a2   : > { %v1475_v58 = vadd.f32 %v1451_v47, %v3628_v15  ;;  %v1428_v60 = vmul.f32 %v1404_v48, %v3652_v37  ;;  %v1407_v61 = vmul.f32 %v3663_v49, %v3663_v49  ;;  %v1405_v62 = vmul.f32 %v3666_v51, %v3666_v51 }
 0x3a3   : > { %v1473_v63 = vadd.f32 %v1449_v55, %v3632_v30  ;;  %v1454_v2 = vmul.f32 0.044715, %v1430_v56  ;;  %v3677_v3 = vmul.f32 %v1556_v40, %v3530_v32  ;;  %v3679_v4 = vpop.eup %3183  ;;  %v3687_v17 = vmul.f32 %v1557_v57, %v3540_v38 }
 0x3a4   : > { %v1499_v5 = vmul.f32 0.7978846, %v1475_v58  ;;  %v1452_v6 = vmul.f32 0.044715, %v1428_v60  ;;  %v1431_v7 = vmul.f32 %v1407_v61, %v3663_v49  ;;  %v1429_v9 = vmul.f32 %v1405_v62, %v3666_v51  ;;  %v3023_v10 = vpop.f32.mrb[32].mxu0  ;;  %v3683_v11 = vpop.eup %3185 }
 0x3a5   : > { %v1497_v13 = vmul.f32 0.7978846, %v1473_v63  ;;  %v1478_v16 = vadd.f32 %v1454_v2, %v3646_v31  ;;  %v3690_v32 = vadd.f32 %v3023_v10, %v3524_v28  ;;  %v1373_v35 = vpop.f32.mrb[33].mxu0  ;;  %v3692_v21 = vpop.eup %3187  ;;  %3193 = vtanh.f32 %v1496_v53 }
 0x3a6   : > { %v1476_v22 = vadd.f32 %v1452_v6, %v3652_v37  ;;  %v1455_v25 = vmul.f32 0.044715, %v1431_v7  ;;  %v1453_v26 = vmul.f32 0.044715, %v1429_v9  ;;  %v3024_v27 = vpop.f32.mrb[34].mxu0  ;;  %3195 = vtanh.f32 %v1499_v5  ;;  %v3190_v40 = vpop.eup %3189 }
 0x3a7   : > { %v1502_v33 = vmul.f32 0.7978846, %v1478_v16  ;;  %v1646_v36 = vpack.c.bf16 %v3687_v17, %v3677_v3  ;;  %v1410_v38 = vmul.f32 %v3690_v32, %v3690_v32  ;;  %v1376_v39 = vpop.f32.mrb[35].mxu0  ;;  %v3702_v45 = vadd.f32 %v3524_v28, %v1373_v35 }
 0x3a8   : > { %v1500_v42 = vmul.f32 0.7978846, %v1476_v22  ;;  %v1479_v43 = vadd.f32 %v1455_v25, %v3663_v49  ;;  %v1477_v44 = vadd.f32 %v1453_v26, %v3666_v51  ;;  %3197 = vtanh.f32 %v1497_v13 }
 0x3a9   : > { %3041 = vmatprep.mubr.bf16.mxu1 %v1646_v36  ;;  %v1434_v46 = vmul.f32 %v1410_v38, %v3690_v32  ;;  %v3706_v47 = vadd.f32 %v3024_v27, %v3524_v28  ;;  %v3709_v48 = vadd.f32 %v3524_v28, %v1376_v39  ;;  %v1408_v56 = vmul.f32 %v3702_v45, %v3702_v45 }
 0x3aa   : > { %3199 = vtanh.f32 %v1500_v42  ;;  %v1503_v53 = vmul.f32 0.7978846, %v1479_v43  ;;  %v1501_v55 = vmul.f32 0.7978846, %v1477_v44  ;;  %3042 = vmatmul.mubr.bf16.vlgmr.msra.gmra.mrb[48].mxu1 %v1647_v20  ;;  %v1536_v28 = vadd.f32 1.0, %v3640_v24 }
 0x3ab   : > { %v1458_v57 = vmul.f32 0.044715, %v1434_v46  ;;  %v1411_v58 = vmul.f32 %v3706_v47, %v3706_v47  ;;  %v1409_v60 = vmul.f32 %v3709_v48, %v3709_v48  ;;  %3201 = vtanh.f32 %v1502_v33  ;;  %v3192_v20 = vpop.eup %3191 }
 0x3ac   : > { %v1432_v61 = vmul.f32 %v1408_v56, %v3702_v45  ;;  %v1537_v62 = vadd.f32 1.0, %v3654_v41  ;;  %v1538_v63 = vadd.f32 1.0, %v3634_v19  ;;  %3203 = vtanh.f32 %v1501_v55 }
 0x3ad   : > { %v1482_v2 = vadd.f32 %v1458_v57, %v3690_v32  ;;  %v1435_v5 = vmul.f32 %v1411_v58, %v3706_v47  ;;  %v1433_v6 = vmul.f32 %v1409_v60, %v3709_v48  ;;  %v1560_v9 = vmul.f32 0.5, %v1536_v28 }
 0x3ae   : > { %v1456_v7 = vmul.f32 0.044715, %v1432_v61  ;;  %v1561_v10 = vmul.f32 0.5, %v1537_v62  ;;  %v1539_v24 = vadd.f32 1.0, %v3648_v34  ;;  %3205 = vtanh.f32 %v1503_v53 }
 0x3af   : > { %v1506_v13 = vmul.f32 0.7978846, %v1482_v2  ;;  %v1459_v16 = vmul.f32 0.044715, %v1435_v5  ;;  %v1457_v35 = vmul.f32 0.044715, %v1433_v6  ;;  %v3194_v41 = vpop.eup %3193  ;;  %v3730_v22 = vmul.f32 %v1560_v9, %v3556_v54 }
 0x3b0   : > { %v1480_v19 = vadd.f32 %v1456_v7, %v3702_v45  ;;  %v3733_v25 = vmul.f32 %v1561_v10, %v3568_v0  ;;  %v1562_v26 = vmul.f32 0.5, %v1538_v63  ;;  %v3196_v27 = vpop.eup %3195  ;;  %v1563_v36 = vmul.f32 0.5, %v1539_v24 }
 0x3b1   : > { %3207 = vtanh.f32 %v1506_v13  ;;  %v1483_v33 = vadd.f32 %v1459_v16, %v3706_v47  ;;  %v1481_v34 = vadd.f32 %v1457_v35, %v3709_v48  ;;  %v1540_v54 = vadd.f32 1.0, %v3683_v11 }
 0x3b2   : > { %v1504_v38 = vmul.f32 0.7978846, %v1480_v19  ;;  %v1648_v39 = vpack.c.bf16 %v3733_v25, %v3730_v22  ;;  %v3740_v42 = vmul.f32 %v1562_v26, %v3552_v50  ;;  %v3198_v43 = vpop.eup %3197  ;;  %v3744_v46 = vmul.f32 %v1563_v36, %v3562_v59 }
 0x3b3   : > { %v1507_v0 = vmul.f32 0.7978846, %v1483_v33  ;;  %v1505_v44 = vmul.f32 0.7978846, %v1481_v34  ;;  %v1541_v53 = vadd.f32 1.0, %v3190_v40  ;;  %v1564_v56 = vmul.f32 0.5, %v1540_v54 }
 0x3b4   : > { %v3200_v55 = vpop.eup %3199  ;;  %3209 = vtanh.f32 %v1504_v38  ;;  %3045 = vmatprep.mubr.bf16.mxu1 %v1648_v39  ;;  %v1542_v57 = vadd.f32 1.0, %v3679_v4  ;;  %v1543_v58 = vadd.f32 1.0, %v3692_v21  ;;  %v1649_v50 = vpack.c.bf16 %v3744_v46, %v3740_v42 }
 0x3b5   : > { %3211 = vtanh.f32 %v1507_v0  ;;  %v1565_v11 = vmul.f32 0.5, %v1541_v53  ;;  %v1544_v60 = vadd.f32 1.0, %v3194_v41  ;;  %v3202_v28 = vpop.eup %3201  ;;  %v3751_v59 = vmul.f32 %v1564_v56, %v3584_v18 }
 0x3b6   : > { %3213 = vtanh.f32 %v1505_v44  ;;  %v1566_v40 = vmul.f32 0.5, %v1542_v57  ;;  %v1567_v61 = vmul.f32 0.5, %v1543_v58  ;;  %v3204_v62 = vpop.eup %3203  ;;  %3046 = vmatmul.mubr.bf16.gmra.mrb[52].mxu1 %v1649_v50  ;;  %v1545_v4 = vadd.f32 1.0, %v3198_v43 }
 0x3b7   : > { %v3754_v63 = vmul.f32 %v1565_v11, %v3596_v29  ;;  %v1568_v21 = vmul.f32 0.5, %v1544_v60  ;;  %v1546_v2 = vadd.f32 1.0, %v3192_v20  ;;  %v1547_v7 = vadd.f32 1.0, %v3196_v27 }
 0x3b8   : > { %v3757_v5 = vmul.f32 %v1566_v40, %v3580_v14  ;;  %v3760_v6 = vmul.f32 %v1567_v61, %v3590_v23  ;;  %v1548_v9 = vadd.f32 1.0, %v3200_v55  ;;  %v3206_v18 = vpop.eup %3205  ;;  %v1569_v24 = vmul.f32 0.5, %v1545_v4 }
 0x3b9   : > { %v1650_v10 = vpack.c.bf16 %v3754_v63, %v3751_v59  ;;  %v1592_v13 = vmul.f32 %v1568_v21, %v3615_v1  ;;  %v1570_v29 = vmul.f32 0.5, %v1546_v2  ;;  %v1571_v20 = vmul.f32 0.5, %v1547_v7 }
 0x3ba   : > { %v1651_v16 = vpack.c.bf16 %v3760_v6, %v3757_v5  ;;  %v1549_v35 = vadd.f32 1.0, %v3204_v62  ;;  %v1572_v14 = vmul.f32 0.5, %v1548_v9  ;;  %v1593_v23 = vmul.f32 %v1569_v24, %v3632_v30 }
 0x3bb   : > { %v3208_v41 = vpop.eup %3207  ;;  %3049 = vmatprep.mubr.bf16.mxu1 %v1650_v10  ;;  %v1604_v19 = vsub.f32 %v3677_v3, %v1592_v13  ;;  %v1594_v26 = vmul.f32 %v1570_v29, %v3608_v52  ;;  %v1550_v27 = vadd.f32 1.0, %v3202_v28  ;;  %v1595_v33 = vmul.f32 %v1571_v20, %v3628_v15 }
 0x3bc   : > { %v1573_v34 = vmul.f32 0.5, %v1549_v35  ;;  %v1596_v1 = vmul.f32 %v1572_v14, %v3652_v37  ;;  %v1551_v36 = vadd.f32 1.0, %v3206_v18  ;;  %v1605_v38 = vsub.f32 %v3687_v17, %v1593_v23 }
 0x3bd   : > { %v1652_v39 = vpack.c.bf16 %v1593_v23, %v1592_v13  ;;  %v1606_v54 = vsub.f32 %v3619_v8, %v1594_v26  ;;  %v1607_v0 = vsub.f32 %v3625_v12, %v1595_v33  ;;  %v1653_v30 = vpack.c.bf16 %v1595_v33, %v1594_v26 }
 0x3be   : > { %v3210_v43 = vpop.eup %3209  ;;  %v1597_v3 = vmul.f32 %v1573_v34, %v3666_v51  ;;  %v1608_v52 = vsub.f32 %v3730_v22, %v1596_v1  ;;  %3050 = vmatmul.mubr.bf16.gmra.mrb[56].mxu1 %v1651_v16  ;;  %v1616_v15 = vmul.f32 %v1604_v19, %v1604_v19  ;;  %v1617_v53 = vmul.f32 %v1605_v38, %v1605_v38  ;;  %v3163_v38 = vld [vmem:[%s4315_s6 + $0xa0] sm:$0xff]  }
 0x3bf   : > { %v3212_v44 = vpop.eup %3211  ;;  %v1574_v55 = vmul.f32 0.5, %v1550_v27  ;;  %v1575_v37 = vmul.f32 0.5, %v1551_v36  ;;  %3053 = vmatprep.mubr.bf16.mxu1 %v1652_v39  ;;  %v1618_v17 = vmul.f32 %v1606_v54, %v1606_v54  ;;  %v1619_v57 = vmul.f32 %v1607_v0, %v1607_v0  ;;  %v3162_v36 = vld [vmem:[%s4315_s6 + $0x98] sm:$0xff]   ;;  %v3164_v39 = vld [vmem:[%s4315_s6 + $0xa8] sm:$0xff]   ;;  %v3165_v54 = vld [vmem:[%s4315_s6 + $0xb0] sm:$0xff]  }
 0x3c0   : > { %v3214_v56 = vpop.eup %3213  ;;  %v1609_v8 = vsub.f32 %v3733_v25, %v1597_v3  ;;  %v1654_v58 = vpack.c.bf16 %v1597_v3, %v1596_v1  ;;  %v1628_v50 = vadd.f32 %v1617_v53, %v1616_v15  ;;  %v1552_v11 = vadd.f32 1.0, %v3210_v43  ;;  %v3161_v1 = vld [vmem:[%s4315_s6 + $0x90] sm:$0xff]   ;;  %v3166_v43 = vld [vmem:[%s4315_s6 + $0xb8] sm:$0xff]   ;;  %v3819_v0 = vld [vmem:[%s4316_s7 + $0x1] ss:$0 sm:$0xff] }
 0x3c1   : > { %v1598_v12 = vmul.f32 %v1574_v55, %v3646_v31  ;;  %v1599_v51 = vmul.f32 %v1575_v37, %v3663_v49  ;;  %v1620_v22 = vmul.f32 %v1608_v52, %v1608_v52  ;;  %v1553_v60 = vadd.f32 1.0, %v3214_v56 }
 0x3c2   : > { %v1554_v28 = vadd.f32 1.0, %v3208_v41  ;;  %v1555_v40 = vadd.f32 1.0, %v3212_v44  ;;  %v1629_v61 = vadd.f32 %v1628_v50, %v1618_v17  ;;  %v1576_v2 = vmul.f32 0.5, %v1552_v11 }
 0x3c3   : > { %v1610_v62 = vsub.f32 %v3740_v42, %v1598_v12  ;;  %v1611_v4 = vsub.f32 %v3744_v46, %v1599_v51  ;;  %v1655_v21 = vpack.c.bf16 %v1599_v51, %v1598_v12  ;;  %v1577_v7 = vmul.f32 0.5, %v1553_v60 }
 0x3c4   : > { %v1578_v25 = vmul.f32 0.5, %v1554_v28  ;;  %v1579_v9 = vmul.f32 0.5, %v1555_v40  ;;  %v1630_v18 = vadd.f32 %v1629_v61, %v1619_v57  ;;  %v1621_v10 = vmul.f32 %v1609_v8, %v1609_v8 }
 0x3c5   : > { %v1600_v31 = vmul.f32 %v1576_v2, %v3702_v45  ;;  %v1601_v49 = vmul.f32 %v1577_v7, %v3709_v48  ;;  %v1622_v14 = vmul.f32 %v1610_v62, %v1610_v62  ;;  %v1623_v48 = vmul.f32 %v1611_v4, %v1611_v4 }
 0x3c6   : > { %v1602_v24 = vmul.f32 %v1578_v25, %v3690_v32  ;;  %v1603_v13 = vmul.f32 %v1579_v9, %v3706_v47  ;;  %3054 = vmatmul.mubr.bf16.gmra.mrb[60].mxu1 %v1653_v30  ;;  %v1631_v29 = vadd.f32 %v1630_v18, %v1620_v22 }
 0x3c7   : > { %3057 = vmatprep.mubr.bf16.mxu1 %v1654_v58  ;;  %v1612_v42 = vsub.f32 %v3751_v59, %v1600_v31  ;;  %v1613_v46 = vsub.f32 %v3754_v63, %v1601_v49  ;;  %v1656_v16 = vpack.c.bf16 %v1601_v49, %v1600_v31 }
 0x3c8   : > { %v1614_v20 = vsub.f32 %v3757_v5, %v1602_v24  ;;  %v1632_v35 = vadd.f32 %v1631_v29, %v1621_v10  ;;  %v1615_v45 = vsub.f32 %v3760_v6, %v1603_v13  ;;  %v1657_v41 = vpack.c.bf16 %v1603_v13, %v1602_v24  ;;  %v3159_v5 = vld [vmem:[%s4315_s6 + $0x80] sm:$0xff]   ;;  %v3160_v6 = vld [vmem:[%s4315_s6 + $0x88] sm:$0xff]  }
 0x3c9   : > { %v1624_v32 = vmul.f32 %v1612_v42, %v1612_v42  ;;  %v1625_v47 = vmul.f32 %v1613_v46, %v1613_v46  ;;  %3065 = vmatprep.subr.bf16.mxu0 %v3159_v5 }
 0x3ca   : > { %v1633_v23 = vadd.f32 %v1632_v35, %v1622_v14  ;;  %v1626_v59 = vmul.f32 %v1614_v20, %v1614_v20  ;;  %v1627_v33 = vmul.f32 %v1615_v45, %v1615_v45  ;;  %3066 = vmatpush3.bf16.msra.mxu0 %v3159_v5 }
 0x3cb   : > { %3067 = vmatprep.subr.bf16.mxu0 %v3160_v6 }
 0x3cc   : > { %v1634_v19 = vadd.f32 %v1633_v23, %v1623_v48 }
 0x3ce   : > { %3058 = vmatmul.mubr.bf16.gmra.mrb[64].mxu1 %v1655_v21  ;;  %v1635_v26 = vadd.f32 %v1634_v19, %v1624_v32  ;;  %3068 = vmatpush3.bf16.msra.mxu0 %v3160_v6 }
 0x3cf   : > { %3061 = vmatprep.mubr.bf16.mxu1 %v1656_v16  ;;  %3069 = vmatprep.subr.bf16.mxu0 %v3161_v1 }
 0x3d0   : > { %v1636_v27 = vadd.f32 %v1635_v26, %v1625_v47 }
 0x3d2   : > { %v1637_v63 = vadd.f32 %v1636_v27, %v1626_v59  ;;  %3070 = vmatpush3.bf16.msra.mxu0 %v3161_v1 }
 0x3d3   : > { %3071 = vmatprep.subr.bf16.mxu0 %v3162_v36 }
 0x3d4   : > { %v3790_v34 = vadd.f32 %v1637_v63, %v1627_v33 }
 0x3d6   : > { %3062 = vmatmul.mubr.bf16.gmra.mrb[68].mxu1 %v1657_v41  ;;  %3072 = vmatpush3.bf16.msra.mxu0 %v3162_v36 }
 0x3d7   : > { %3073 = vmatprep.subr.bf16.mxu0 %v3163_v38 }
 0x3da   : > { %3074 = vmatpush3.bf16.msra.mxu0 %v3163_v38 }
 0x3db   : > { %3075 = vmatprep.subr.bf16.mxu0 %v3164_v39 }
 0x3de   : > { %3076 = vmatpush3.bf16.msra.mxu0 %v3164_v39 }
 0x3df   : > { %3077 = vmatprep.subr.bf16.mxu0 %v3165_v54 }
 0x3e2   : > { %3078 = vmatpush3.bf16.msra.mxu0 %v3165_v54 }
 0x3e3   : > { %3079 = vmatprep.subr.bf16.mxu0 %v3166_v43 }
 0x3e6   : > { %3080 = vmatpush3.bf16.msra.mxu0 %v3166_v43 }
 0x47d   : > { %v3043_v30 = vpop.f32.mrb[48].mxu1 }
 0x47e   : > { %v3822_v3 = vadd.f32 %v3043_v30, %v3819_v0  ;;  %v1765_v52 = vpop.f32.mrb[49].mxu1 }
 0x47f   : > { %v3825_v44 = vadd.f32 %v3819_v0, %v1765_v52  ;;  %v3044_v15 = vpop.f32.mrb[50].mxu1 }
 0x480   : > { %v1862_v53 = vmul.f32 %v3822_v3, %v3822_v3  ;;  %v3830_v55 = vadd.f32 %v3044_v15, %v3819_v0  ;;  %v1768_v37 = vpop.f32.mrb[51].mxu1 }
 0x481   : > { %v1860_v56 = vmul.f32 %v3825_v44, %v3825_v44  ;;  %v3835_v17 = vadd.f32 %v3819_v0, %v1768_v37 }
 0x482   : > { %v1886_v57 = vmul.f32 %v1862_v53, %v3822_v3  ;;  %v1863_v8 = vmul.f32 %v3830_v55, %v3830_v55 }
 0x483   : > { %v1884_v58 = vmul.f32 %v1860_v56, %v3825_v44  ;;  %v1861_v50 = vmul.f32 %v3835_v17, %v3835_v17 }
 0x484   : > { %v1910_v12 = vmul.f32 0.044715, %v1886_v57  ;;  %v1887_v51 = vmul.f32 %v1863_v8, %v3830_v55 }
 0x485   : > { %v1908_v11 = vmul.f32 0.044715, %v1884_v58  ;;  %v1885_v22 = vmul.f32 %v1861_v50, %v3835_v17 }
 0x486   : > { %v1934_v60 = vadd.f32 %v1910_v12, %v3822_v3  ;;  %v1911_v28 = vmul.f32 0.044715, %v1887_v51 }
 0x487   : > { %v1932_v40 = vadd.f32 %v1908_v11, %v3825_v44  ;;  %v1909_v61 = vmul.f32 0.044715, %v1885_v22 }
 0x488   : > { %v1958_v62 = vmul.f32 0.7978846, %v1934_v60  ;;  %v1935_v4 = vadd.f32 %v1911_v28, %v3830_v55 }
 0x489   : > { %v1956_v21 = vmul.f32 0.7978846, %v1932_v40  ;;  %v3047_v7 = vpop.f32.mrb[52].mxu1  ;;  %v1933_v25 = vadd.f32 %v1909_v61, %v3835_v17 }
 0x48a   : > { %3215 = vtanh.f32 %v1958_v62  ;;  %v1959_v2 = vmul.f32 0.7978846, %v1935_v4  ;;  %v3850_v9 = vadd.f32 %v3047_v7, %v3819_v0  ;;  %v1781_v18 = vpop.f32.mrb[53].mxu1 }
 0x48b   : > { %v3853_v10 = vadd.f32 %v3819_v0, %v1781_v18  ;;  %v3048_v31 = vpop.f32.mrb[54].mxu1  ;;  %v1957_v46 = vmul.f32 0.7978846, %v1933_v25 }
 0x48c   : > { %3217 = vtanh.f32 %v1959_v2  ;;  %v1866_v49 = vmul.f32 %v3850_v9, %v3850_v9  ;;  %v3858_v24 = vadd.f32 %v3048_v31, %v3819_v0  ;;  %v1784_v13 = vpop.f32.mrb[55].mxu1 }
 0x48d   : > { %3219 = vtanh.f32 %v1956_v21  ;;  %v1864_v29 = vmul.f32 %v3853_v10, %v3853_v10  ;;  %v3863_v42 = vadd.f32 %v3819_v0, %v1784_v13 }
 0x48e   : > { %v1890_v16 = vmul.f32 %v1866_v49, %v3850_v9  ;;  %v1867_v20 = vmul.f32 %v3858_v24, %v3858_v24  ;;  %3221 = vtanh.f32 %v1957_v46 }
 0x48f   : > { %v1888_v35 = vmul.f32 %v1864_v29, %v3853_v10  ;;  %v1865_v14 = vmul.f32 %v3863_v42, %v3863_v42 }
 0x490   : > { %v1914_v45 = vmul.f32 0.044715, %v1890_v16  ;;  %v1891_v41 = vmul.f32 %v1867_v20, %v3858_v24 }
 0x491   : > { %v1912_v48 = vmul.f32 0.044715, %v1888_v35  ;;  %v1889_v23 = vmul.f32 %v1865_v14, %v3863_v42  ;;  %v3051_v32 = vpop.f32.mrb[56].mxu1 }
 0x492   : > { %v1938_v19 = vadd.f32 %v1914_v45, %v3850_v9  ;;  %v1915_v47 = vmul.f32 0.044715, %v1891_v41  ;;  %v3875_v26 = vadd.f32 %v3051_v32, %v3819_v0  ;;  %v1797_v27 = vpop.f32.mrb[57].mxu1 }
 0x493   : > { %v1936_v33 = vadd.f32 %v1912_v48, %v3853_v10  ;;  %v1913_v63 = vmul.f32 0.044715, %v1889_v23  ;;  %v3879_v5 = vadd.f32 %v3819_v0, %v1797_v27  ;;  %v3052_v6 = vpop.f32.mrb[58].mxu1 }
 0x494   : > { %v3216_v59 = vpop.eup %3215  ;;  %v1962_v36 = vmul.f32 0.7978846, %v1938_v19  ;;  %v1939_v38 = vadd.f32 %v1915_v47, %v3858_v24  ;;  %v1870_v39 = vmul.f32 %v3875_v26, %v3875_v26  ;;  %v1800_v54 = vpop.f32.mrb[59].mxu1  ;;  %v3888_v53 = vadd.f32 %v3052_v6, %v3819_v0 }
 0x495   : > { %v2006_v1 = vadd.f32 1.0, %v3216_v59  ;;  %v1960_v30 = vmul.f32 0.7978846, %v1936_v33  ;;  %v1937_v52 = vadd.f32 %v1913_v63, %v3863_v42  ;;  %v1868_v15 = vmul.f32 %v3879_v5, %v3879_v5 }
 0x496   : > { %v3218_v43 = vpop.eup %3217  ;;  %3223 = vtanh.f32 %v1962_v36  ;;  %v1963_v57 = vmul.f32 0.7978846, %v1939_v38  ;;  %v1894_v50 = vmul.f32 %v1870_v39, %v3875_v26  ;;  %v1871_v22 = vmul.f32 %v3888_v53, %v3888_v53 }
 0x497   : > { %v2030_v37 = vmul.f32 0.5, %v2006_v1  ;;  %v2007_v56 = vadd.f32 1.0, %v3218_v43  ;;  %v3220_v8 = vpop.eup %3219  ;;  %3225 = vtanh.f32 %v1960_v30  ;;  %v1961_v58 = vmul.f32 0.7978846, %v1937_v52 }
 0x498   : > { %v1892_v12 = vmul.f32 %v1868_v15, %v3879_v5  ;;  %3227 = vtanh.f32 %v1963_v57  ;;  %v1918_v60 = vmul.f32 0.044715, %v1894_v50  ;;  %v3898_v40 = vadd.f32 %v3819_v0, %v1800_v54 }
 0x499   : > { %v3893_v51 = vmul.f32 %v2030_v37, %v3822_v3  ;;  %v2031_v11 = vmul.f32 0.5, %v2007_v56  ;;  %3229 = vtanh.f32 %v1961_v58  ;;  %v3055_v61 = vpop.f32.mrb[60].mxu1  ;;  %v1895_v4 = vmul.f32 %v1871_v22, %v3888_v53 }
 0x49a   : > { %v1916_v28 = vmul.f32 0.044715, %v1892_v12  ;;  %v3905_v3 = vadd.f32 %v3055_v61, %v3819_v0  ;;  %v1813_v21 = vpop.f32.mrb[61].mxu1  ;;  %v2004_v2 = vadd.f32 1.0, %v3220_v8  ;;  %v1942_v7 = vadd.f32 %v1918_v60, %v3875_v26 }
 0x49b   : > { %v3901_v62 = vmul.f32 %v2031_v11, %v3830_v55  ;;  %v1869_v18 = vmul.f32 %v3898_v40, %v3898_v40  ;;  %v3912_v31 = vadd.f32 %v3819_v0, %v1813_v21  ;;  %v3056_v49 = vpop.f32.mrb[62].mxu1  ;;  %v3222_v55 = vpop.eup %3221  ;;  %v1919_v29 = vmul.f32 0.044715, %v1895_v4 }
 0x49c   : > { %v1940_v25 = vadd.f32 %v1916_v28, %v3879_v5  ;;  %v1874_v46 = vmul.f32 %v3905_v3, %v3905_v3  ;;  %v3919_v16 = vadd.f32 %v3056_v49, %v3819_v0  ;;  %v1816_v20 = vpop.f32.mrb[63].mxu1  ;;  %v1966_v35 = vmul.f32 0.7978846, %v1942_v7 }
 0x49d   : > { %v2119_v13 = vpack.c.bf16 %v3901_v62, %v3893_v51  ;;  %v1893_v45 = vmul.f32 %v1869_v18, %v3898_v40  ;;  %v1872_v41 = vmul.f32 %v3912_v31, %v3912_v31  ;;  %v1943_v48 = vadd.f32 %v1919_v29, %v3888_v53 }
 0x49e   : > { %v1964_v14 = vmul.f32 0.7978846, %v1940_v25  ;;  %v1898_v23 = vmul.f32 %v1874_v46, %v3905_v3  ;;  %v1875_v32 = vmul.f32 %v3919_v16, %v3919_v16  ;;  %v3929_v19 = vadd.f32 %v3819_v0, %v1816_v20 }
 0x49f   : > { %3231 = vtanh.f32 %v1966_v35  ;;  %v1917_v47 = vmul.f32 0.044715, %v1893_v45  ;;  %v1896_v27 = vmul.f32 %v1872_v41, %v3912_v31  ;;  %v2005_v59 = vadd.f32 1.0, %v3222_v55 }
 0x4a0   : > { %v3932_v33 = vpop.eup %3223  ;;  %3233 = vtanh.f32 %v1964_v14  ;;  %v1967_v63 = vmul.f32 0.7978846, %v1943_v48  ;;  %v1922_v6 = vmul.f32 0.044715, %v1898_v23  ;;  %v1899_v1 = vmul.f32 %v1875_v32, %v3919_v16 }
 0x4a1   : > { %v3935_v36 = vpop.eup %3225  ;;  %v1941_v38 = vadd.f32 %v1917_v47, %v3898_v40  ;;  %v1920_v39 = vmul.f32 0.044715, %v1896_v27  ;;  %v1873_v54 = vmul.f32 %v3929_v19, %v3929_v19  ;;  %v3059_v43 = vpop.f32.mrb[64].mxu1  ;;  %v2028_v30 = vmul.f32 0.5, %v2004_v2 }
 0x4a2   : > { %v3940_v52 = vpop.eup %3227  ;;  %3235 = vtanh.f32 %v1967_v63  ;;  %v1946_v15 = vadd.f32 %v1922_v6, %v3905_v3  ;;  %v1923_v37 = vmul.f32 0.044715, %v1899_v1  ;;  %v3944_v56 = vadd.f32 %v3059_v43, %v3819_v0  ;;  %v1829_v57 = vpop.f32.mrb[65].mxu1 }
 0x4a3   : > { %v3946_v8 = vpop.eup %3229  ;;  %v1965_v58 = vmul.f32 0.7978846, %v1941_v38  ;;  %v1944_v50 = vadd.f32 %v1920_v39, %v3912_v31  ;;  %v1897_v12 = vmul.f32 %v1873_v54, %v3929_v19  ;;  %v3951_v11 = vadd.f32 %v3819_v0, %v1829_v57  ;;  %v3060_v22 = vpop.f32.mrb[66].mxu1 }
 0x4a4   : > { %v1970_v60 = vmul.f32 0.7978846, %v1946_v15  ;;  %v1947_v28 = vadd.f32 %v1923_v37, %v3919_v16  ;;  %v1878_v61 = vmul.f32 %v3944_v56, %v3944_v56  ;;  %v3957_v4 = vadd.f32 %v3060_v22, %v3819_v0  ;;  %v1832_v21 = vpop.f32.mrb[67].mxu1 }
 0x4a5   : > { %3237 = vtanh.f32 %v1965_v58  ;;  %v1968_v2 = vmul.f32 0.7978846, %v1944_v50  ;;  %v1921_v7 = vmul.f32 0.044715, %v1897_v12  ;;  %v1876_v25 = vmul.f32 %v3951_v11, %v3951_v11 }
 0x4a6   : > { %3239 = vtanh.f32 %v1970_v60  ;;  %v1971_v18 = vmul.f32 0.7978846, %v1947_v28  ;;  %v1902_v49 = vmul.f32 %v1878_v61, %v3944_v56  ;;  %v1879_v55 = vmul.f32 %v3957_v4, %v3957_v4 }
 0x4a7   : > { %3241 = vtanh.f32 %v1968_v2  ;;  %v1945_v29 = vadd.f32 %v1921_v7, %v3929_v19  ;;  %v1900_v46 = vmul.f32 %v1876_v25, %v3951_v11  ;;  %v3967_v20 = vadd.f32 %v3819_v0, %v1832_v21 }
 0x4a8   : > { %3243 = vtanh.f32 %v1971_v18  ;;  %v1926_v35 = vmul.f32 0.044715, %v1902_v49  ;;  %v1903_v14 = vmul.f32 %v1879_v55, %v3957_v4  ;;  %v2029_v45 = vmul.f32 0.5, %v2005_v59 }
 0x4a9   : > { %v3970_v41 = vpop.eup %3231  ;;  %v1969_v48 = vmul.f32 0.7978846, %v1945_v29  ;;  %v1924_v23 = vmul.f32 0.044715, %v1900_v46  ;;  %v1877_v32 = vmul.f32 %v3967_v20, %v3967_v20  ;;  %v3975_v47 = vmul.f32 %v2028_v30, %v3825_v44  ;;  %v3063_v27 = vpop.f32.mrb[68].mxu1 }
 0x4aa   : > { %v3234_v63 = vpop.eup %3233  ;;  %v1950_v6 = vadd.f32 %v1926_v35, %v3944_v56  ;;  %v1927_v1 = vmul.f32 0.044715, %v1903_v14  ;;  %v3979_v38 = vmul.f32 %v2029_v45, %v3835_v17  ;;  %v3982_v59 = vadd.f32 %v3063_v27, %v3819_v0  ;;  %v1845_v39 = vpop.f32.mrb[69].mxu1 }
 0x4ab   : > { %3245 = vtanh.f32 %v1969_v48  ;;  %v1948_v54 = vadd.f32 %v1924_v23, %v3951_v11  ;;  %v1901_v43 = vmul.f32 %v1877_v32, %v3967_v20  ;;  %v3987_v44 = vadd.f32 %v3819_v0, %v1845_v39  ;;  %v3064_v30 = vpop.f32.mrb[70].mxu1 }
 0x4ac   : > { %v3989_v15 = vpop.eup %3235  ;;  %v1974_v37 = vmul.f32 0.7978846, %v1950_v6  ;;  %v1951_v57 = vadd.f32 %v1927_v1, %v3957_v4  ;;  %v2118_v17 = vpack.c.bf16 %v3979_v38, %v3975_v47  ;;  %v1882_v58 = vmul.f32 %v3982_v59, %v3982_v59  ;;  %v1848_v50 = vpop.f32.mrb[71].mxu1 }
 0x4ad   : > { %v1972_v12 = vmul.f32 0.7978846, %v1948_v54  ;;  %v1925_v22 = vmul.f32 0.044715, %v1901_v43  ;;  %v1880_v60 = vmul.f32 %v3987_v44, %v3987_v44  ;;  %v3999_v28 = vadd.f32 %v3064_v30, %v3819_v0 }
 0x4ae   : > { %3247 = vtanh.f32 %v1974_v37  ;;  %v1975_v61 = vmul.f32 0.7978846, %v1951_v57  ;;  %3081 = vmatprep.mubr.bf16.mxu0 %v2118_v17  ;;  %v1906_v21 = vmul.f32 %v1882_v58, %v3982_v59  ;;  %v4003_v2 = vadd.f32 %v3819_v0, %v1848_v50 }
 0x4af   : > { %v3238_v7 = vpop.eup %3237  ;;  %3249 = vtanh.f32 %v1972_v12  ;;  %v1949_v25 = vadd.f32 %v1925_v22, %v3967_v20  ;;  %3082 = vmatmul.mubr.bf16.vlgmr.msra.gmra.mrb[36].mxu0 %v2119_v13  ;;  %v1904_v18 = vmul.f32 %v1880_v60, %v3987_v44  ;;  %v1883_v49 = vmul.f32 %v3999_v28, %v3999_v28 }
 0x4b0   : > { %v3240_v55 = vpop.eup %3239  ;;  %3251 = vtanh.f32 %v1975_v61  ;;  %v1930_v29 = vmul.f32 0.044715, %v1906_v21  ;;  %v1881_v0 = vmul.f32 %v4003_v2, %v4003_v2  ;;  %v2008_v46 = vadd.f32 1.0, %v3935_v36 }
 0x4b1   : > { %v3242_v35 = vpop.eup %3241  ;;  %v1973_v14 = vmul.f32 0.7978846, %v1949_v25  ;;  %v1928_v45 = vmul.f32 0.044715, %v1904_v18  ;;  %v1907_v48 = vmul.f32 %v1883_v49, %v3999_v28  ;;  %v2009_v13 = vadd.f32 1.0, %v3946_v8 }
 0x4b2   : > { %v3244_v23 = vpop.eup %3243  ;;  %v1954_v32 = vadd.f32 %v1930_v29, %v3982_v59  ;;  %v1905_v27 = vmul.f32 %v1881_v0, %v4003_v2  ;;  %v2032_v6 = vmul.f32 0.5, %v2008_v46  ;;  %v2010_v1 = vadd.f32 1.0, %v3932_v33 }
 0x4b3   : > { %3253 = vtanh.f32 %v1973_v14  ;;  %v1952_v39 = vadd.f32 %v1928_v45, %v3987_v44  ;;  %v1931_v54 = vmul.f32 0.044715, %v1907_v48  ;;  %v2033_v36 = vmul.f32 0.5, %v2009_v13 }
 0x4b4   : > { %v1978_v43 = vmul.f32 0.7978846, %v1954_v32  ;;  %v1929_v30 = vmul.f32 0.044715, %v1905_v27  ;;  %v4022_v37 = vmul.f32 %v2032_v6, %v3853_v10  ;;  %v2011_v8 = vadd.f32 1.0, %v3940_v52 }
 0x4b5   : > { %v3246_v57 = vpop.eup %3245  ;;  %v1976_v17 = vmul.f32 0.7978846, %v1952_v39  ;;  %v1955_v58 = vadd.f32 %v1931_v54, %v3999_v28  ;;  %v4027_v50 = vmul.f32 %v2033_v36, %v3863_v42  ;;  %v2034_v33 = vmul.f32 0.5, %v2010_v1 }
 0x4b6   : > { %3255 = vtanh.f32 %v1978_v43  ;;  %v1953_v12 = vadd.f32 %v1929_v30, %v4003_v2  ;;  %v2035_v22 = vmul.f32 0.5, %v2011_v8  ;;  %v2012_v60 = vadd.f32 1.0, %v3234_v63 }
 0x4b7   : > { %3257 = vtanh.f32 %v1976_v17  ;;  %v1979_v61 = vmul.f32 0.7978846, %v1955_v58  ;;  %v2120_v10 = vpack.c.bf16 %v4027_v50, %v4022_v37  ;;  %v4033_v52 = vmul.f32 %v2034_v33, %v3850_v9 }
 0x4b8   : > { %v3248_v21 = vpop.eup %3247  ;;  %v1977_v25 = vmul.f32 0.7978846, %v1953_v12  ;;  %v4036_v18 = vmul.f32 %v2035_v22, %v3858_v24  ;;  %v2013_v42 = vadd.f32 1.0, %v3238_v7  ;;  %v2036_v49 = vmul.f32 0.5, %v2012_v60 }
 0x4b9   : > { %v3250_v29 = vpop.eup %3249  ;;  %3259 = vtanh.f32 %v1979_v61  ;;  %3085 = vmatprep.mubr.bf16.mxu0 %v2120_v10  ;;  %v2014_v63 = vadd.f32 1.0, %v3970_v41  ;;  %v2015_v0 = vadd.f32 1.0, %v3989_v15  ;;  %v2016_v46 = vadd.f32 1.0, %v3242_v35 }
 0x4ba   : > { %v3252_v14 = vpop.eup %3251  ;;  %3261 = vtanh.f32 %v1977_v25  ;;  %v2121_v9 = vpack.c.bf16 %v4036_v18, %v4033_v52  ;;  %v2037_v45 = vmul.f32 0.5, %v2013_v42  ;;  %v4043_v48 = vmul.f32 %v2036_v49, %v3879_v5 }
 0x4bb   : > { %v2038_v24 = vmul.f32 0.5, %v2014_v63  ;;  %v2039_v7 = vmul.f32 0.5, %v2015_v0  ;;  %v2017_v13 = vadd.f32 1.0, %v3246_v57  ;;  %v2040_v32 = vmul.f32 0.5, %v2016_v46 }
 0x4bc   : > { %3086 = vmatmul.mubr.bf16.gmra.mrb[40].mxu0 %v2121_v9  ;;  %v4046_v27 = vmul.f32 %v2037_v45, %v3898_v40  ;;  %v2018_v41 = vadd.f32 1.0, %v3240_v55  ;;  %v2019_v15 = vadd.f32 1.0, %v3244_v23  ;;  %v2020_v35 = vadd.f32 1.0, %v3250_v29 }
 0x4bd   : > { %v3254_v6 = vpop.eup %3253  ;;  %v4049_v1 = vmul.f32 %v2038_v24, %v3875_v26  ;;  %v4052_v39 = vmul.f32 %v2039_v7, %v3888_v53  ;;  %v2041_v5 = vmul.f32 0.5, %v2017_v13  ;;  %v2064_v54 = vmul.f32 %v2040_v32, %v3912_v31 }
 0x4be   : > { %v2122_v36 = vpack.c.bf16 %v4046_v27, %v4043_v48  ;;  %v2042_v43 = vmul.f32 0.5, %v2018_v41  ;;  %v2043_v30 = vmul.f32 0.5, %v2019_v15  ;;  %v2021_v40 = vadd.f32 1.0, %v3254_v6 }
 0x4bf   : > { %v2123_v55 = vpack.c.bf16 %v4052_v39, %v4049_v1  ;;  %v2065_v23 = vmul.f32 %v2041_v5, %v3929_v19  ;;  %v2076_v26 = vsub.f32 %v3975_v47, %v2064_v54  ;;  %v2044_v8 = vmul.f32 0.5, %v2020_v35 }
 0x4c0   : > { %v3256_v57 = vpop.eup %3255  ;;  %3089 = vmatprep.mubr.bf16.mxu0 %v2122_v36  ;;  %v2066_v53 = vmul.f32 %v2042_v43, %v3905_v3  ;;  %v2067_v31 = vmul.f32 %v2043_v30, %v3919_v16  ;;  %v2045_v17 = vmul.f32 0.5, %v2021_v40  ;;  %v2022_v58 = vadd.f32 1.0, %v3248_v21 }
 0x4c1   : > { %v3258_v33 = vpop.eup %3257  ;;  %v2077_v12 = vsub.f32 %v3979_v38, %v2065_v23  ;;  %v2088_v22 = vmul.f32 %v2076_v26, %v2076_v26  ;;  %v2124_v60 = vpack.c.bf16 %v2065_v23, %v2064_v54  ;;  %v2068_v61 = vmul.f32 %v2044_v8, %v3951_v11 }
 0x4c2   : > { %v2078_v19 = vsub.f32 %v3893_v51, %v2066_v53  ;;  %v2079_v47 = vsub.f32 %v3901_v62, %v2067_v31  ;;  %v2125_v10 = vpack.c.bf16 %v2067_v31, %v2066_v53  ;;  %v2069_v25 = vmul.f32 %v2045_v17, %v3967_v20 }
 0x4c3   : > { %v3260_v42 = vpop.eup %3259  ;;  %v2089_v3 = vmul.f32 %v2077_v12, %v2077_v12  ;;  %v2080_v16 = vsub.f32 %v4022_v37, %v2068_v61  ;;  %v2023_v49 = vadd.f32 1.0, %v3252_v14  ;;  %v2046_v21 = vmul.f32 0.5, %v2022_v58 }
 0x4c4   : > { %v3262_v29 = vpop.eup %3261  ;;  %3090 = vmatmul.mubr.bf16.gmra.mrb[44].mxu0 %v2123_v55  ;;  %v2090_v38 = vmul.f32 %v2078_v19, %v2078_v19  ;;  %v2081_v63 = vsub.f32 %v4027_v50, %v2069_v25  ;;  %v2126_v0 = vpack.c.bf16 %v2069_v25, %v2068_v61  ;;  %v2091_v51 = vmul.f32 %v2079_v47, %v2079_v47 }
 0x4c5   : > { %v2100_v11 = vadd.f32 %v2089_v3, %v2088_v22  ;;  %3093 = vmatprep.mubr.bf16.mxu0 %v2124_v60  ;;  %v2047_v46 = vmul.f32 0.5, %v2023_v49  ;;  %v2070_v62 = vmul.f32 %v2046_v21, %v3944_v56  ;;  %v2092_v9 = vmul.f32 %v2080_v16, %v2080_v16 }
 0x4c6   : > { %v2024_v20 = vadd.f32 1.0, %v3258_v33  ;;  %v2025_v45 = vadd.f32 1.0, %v3262_v29  ;;  %v2026_v24 = vadd.f32 1.0, %v3256_v57  ;;  %v2027_v13 = vadd.f32 1.0, %v3260_v42 }
 0x4c7   : > { %v2101_v7 = vadd.f32 %v2100_v11, %v2090_v38  ;;  %v2071_v37 = vmul.f32 %v2047_v46, %v3957_v4  ;;  %v2082_v14 = vsub.f32 %v4033_v52, %v2070_v62  ;;  %v2093_v35 = vmul.f32 %v2081_v63, %v2081_v63 }
 0x4c8   : > { %v2048_v32 = vmul.f32 0.5, %v2024_v20  ;;  %v2049_v41 = vmul.f32 0.5, %v2025_v45  ;;  %v2050_v50 = vmul.f32 0.5, %v2026_v24  ;;  %v2051_v36 = vmul.f32 0.5, %v2027_v13 }
 0x4c9   : > { %v2102_v15 = vadd.f32 %v2101_v7, %v2091_v51  ;;  %v2083_v6 = vsub.f32 %v4036_v18, %v2071_v37  ;;  %v2127_v5 = vpack.c.bf16 %v2071_v37, %v2070_v62  ;;  %v2094_v18 = vmul.f32 %v2082_v14, %v2082_v14 }
 0x4ca   : > { %v2072_v56 = vmul.f32 %v2048_v32, %v3987_v44  ;;  %v2073_v54 = vmul.f32 %v2049_v41, %v4003_v2  ;;  %v2074_v43 = vmul.f32 %v2050_v50, %v3982_v59  ;;  %v2075_v55 = vmul.f32 %v2051_v36, %v3999_v28 }
 0x4cb   : > { %v2103_v30 = vadd.f32 %v2102_v15, %v2092_v9  ;;  %v2095_v8 = vmul.f32 %v2083_v6, %v2083_v6  ;;  %v1639_v53 = vrot.slane %v3790_v34, 4 }
 0x4cc   : > { %3094 = vmatmul.mubr.bf16.gmra.mrb[48].mxu0 %v2125_v10  ;;  %v2084_v4 = vsub.f32 %v4043_v48, %v2072_v56  ;;  %v2085_v52 = vsub.f32 %v4046_v27, %v2073_v54  ;;  %v2128_v40 = vpack.c.bf16 %v2073_v54, %v2072_v56  ;;  %v2086_v26 = vsub.f32 %v4049_v1, %v2074_v43 }
 0x4cd   : > { %v2104_v23 = vadd.f32 %v2103_v30, %v2093_v35  ;;  %3097 = vmatprep.mubr.bf16.mxu0 %v2126_v0  ;;  %v2087_v44 = vsub.f32 %v4052_v39, %v2075_v55  ;;  %v2129_v2 = vpack.c.bf16 %v2075_v55, %v2074_v43  ;;  %v1640_v27 = vadd.f32 %v1639_v53, %v3790_v34  ;;  %v4089_v34 = vld [vmem:[%s4316_s7 + $0x2] ss:$0 sm:$0xff] }
 0x4ce   : > { %v2096_v59 = vmul.f32 %v2084_v4, %v2084_v4  ;;  %v2097_v48 = vmul.f32 %v2085_v52, %v2085_v52  ;;  %v2098_v58 = vmul.f32 %v2086_v26, %v2086_v26 }
 0x4cf   : > { %v2105_v57 = vadd.f32 %v2104_v23, %v2094_v18  ;;  %v2099_v33 = vmul.f32 %v2087_v44, %v2087_v44  ;;  %v1641_v1 = vrot.slane %v1640_v27, 2 }
 0x4d1   : > { %v2106_v31 = vadd.f32 %v2105_v57, %v2095_v8  ;;  %v1642_v60 = vadd.f32 %v1641_v1, %v1640_v27 }
 0x4d3   : > { %v2107_v17 = vadd.f32 %v2106_v31, %v2096_v59  ;;  %v1643_v47 = vrot.slane %v1642_v60, 1 }
 0x4d4   : > { %3098 = vmatmul.mubr.bf16.gmra.mrb[52].mxu0 %v2127_v5 }
 0x4d5   : > { %v2108_v28 = vadd.f32 %v2107_v17, %v2097_v48  ;;  %3101 = vmatprep.mubr.bf16.mxu0 %v2128_v40  ;;  %v1644_v42 = vadd.f32 %v1643_v47, %v1642_v60 }
 0x4d7   : > { %v2109_v12 = vadd.f32 %v2108_v28, %v2098_v58 }
 0x4d9   : > { %v2110_v22 = vadd.f32 %v2109_v12, %v2099_v33 }
 0x4db   : > { %v2111_v39 = vrot.slane %v2110_v22, 4 }
 0x4dc   : > { %3102 = vmatmul.mubr.bf16.gmra.mrb[56].mxu0 %v2129_v2 }
 0x4dd   : > { %v2112_v61 = vadd.f32 %v2111_v39, %v2110_v22 }
 0x4df   : > { %v2113_v19 = vrot.slane %v2112_v61, 2 }
 0x4e1   : > { %v2114_v10 = vadd.f32 %v2113_v19, %v2112_v61 }
 0x4e3   : > { %v2115_v25 = vrot.slane %v2114_v10, 1 }
 0x4e5   : > { %v2116_v3 = vadd.f32 %v2115_v25, %v2114_v10 }
 0x4e7   : > { %v4084_v16 = vadd.f32 %v2116_v3, %v1644_v42 }
 0x582   : > { %v3083_v49 = vpop.f32.mrb[36].mxu0 }
 0x583   : > { %v4092_v21 = vadd.f32 %v3083_v49, %v4089_v34  ;;  %v2237_v29 = vpop.f32.mrb[37].mxu0 }
 0x584   : > { %v4095_v38 = vadd.f32 %v4089_v34, %v2237_v29  ;;  %v3084_v63 = vpop.f32.mrb[38].mxu0 }
 0x585   : > { %v2334_v0 = vmul.f32 %v4092_v21, %v4092_v21  ;;  %v4100_v11 = vadd.f32 %v3084_v63, %v4089_v34  ;;  %v2240_v51 = vpop.f32.mrb[39].mxu0 }
 0x586   : > { %v2332_v46 = vmul.f32 %v4095_v38, %v4095_v38  ;;  %v4105_v62 = vadd.f32 %v4089_v34, %v2240_v51 }
 0x587   : > { %v2358_v9 = vmul.f32 %v2334_v0, %v4092_v21  ;;  %v2335_v20 = vmul.f32 %v4100_v11, %v4100_v11 }
 0x588   : > { %v2356_v45 = vmul.f32 %v2332_v46, %v4095_v38  ;;  %v2333_v24 = vmul.f32 %v4105_v62, %v4105_v62 }
 0x589   : > { %v2382_v7 = vmul.f32 0.044715, %v2358_v9  ;;  %v2359_v37 = vmul.f32 %v2335_v20, %v4100_v11 }
 0x58a   : > { %v2380_v14 = vmul.f32 0.044715, %v2356_v45  ;;  %v2357_v13 = vmul.f32 %v2333_v24, %v4105_v62 }
 0x58b   : > { %v2406_v32 = vadd.f32 %v2382_v7, %v4092_v21  ;;  %v2383_v41 = vmul.f32 0.044715, %v2359_v37 }
 0x58c   : > { %v2404_v50 = vadd.f32 %v2380_v14, %v4095_v38  ;;  %v2381_v15 = vmul.f32 0.044715, %v2357_v13 }
 0x58d   : > { %v2430_v35 = vmul.f32 0.7978846, %v2406_v32  ;;  %v2407_v6 = vadd.f32 %v2383_v41, %v4100_v11 }
 0x58e   : > { %v2428_v5 = vmul.f32 0.7978846, %v2404_v50  ;;  %v2405_v56 = vadd.f32 %v2381_v15, %v4105_v62 }
 0x58f   : > { %v3087_v54 = vpop.f32.mrb[40].mxu0  ;;  %3263 = vtanh.f32 %v2430_v35  ;;  %v2431_v30 = vmul.f32 0.7978846, %v2407_v6 }
 0x590   : > { %v4120_v36 = vadd.f32 %v3087_v54, %v4089_v34  ;;  %v2253_v43 = vpop.f32.mrb[41].mxu0  ;;  %3265 = vtanh.f32 %v2428_v5  ;;  %v2429_v40 = vmul.f32 0.7978846, %v2405_v56 }
 0x591   : > { %v4123_v4 = vadd.f32 %v4089_v34, %v2253_v43  ;;  %v3088_v52 = vpop.f32.mrb[42].mxu0  ;;  %3267 = vtanh.f32 %v2431_v30 }
 0x592   : > { %v2338_v55 = vmul.f32 %v4120_v36, %v4120_v36  ;;  %v4128_v23 = vadd.f32 %v3088_v52, %v4089_v34  ;;  %v2256_v18 = vpop.f32.mrb[43].mxu0  ;;  %3269 = vtanh.f32 %v2429_v40 }
 0x593   : > { %v2336_v26 = vmul.f32 %v4123_v4, %v4123_v4  ;;  %v4133_v44 = vadd.f32 %v4089_v34, %v2256_v18 }
 0x594   : > { %v2362_v2 = vmul.f32 %v2338_v55, %v4120_v36  ;;  %v2339_v8 = vmul.f32 %v4128_v23, %v4128_v23 }
 0x595   : > { %v2360_v57 = vmul.f32 %v2336_v26, %v4123_v4  ;;  %v2337_v59 = vmul.f32 %v4133_v44, %v4133_v44 }
 0x596   : > { %v2386_v53 = vmul.f32 0.044715, %v2362_v2  ;;  %v2363_v31 = vmul.f32 %v2339_v8, %v4128_v23 }
 0x597   : > { %v2384_v48 = vmul.f32 0.044715, %v2360_v57  ;;  %v3091_v17 = vpop.f32.mrb[44].mxu0  ;;  %v2361_v27 = vmul.f32 %v2337_v59, %v4133_v44 }
 0x598   : > { %v4144_v28 = vadd.f32 %v3091_v17, %v4089_v34  ;;  %v2269_v58 = vpop.f32.mrb[45].mxu0  ;;  %v2410_v33 = vadd.f32 %v2386_v53, %v4120_v36  ;;  %v2387_v22 = vmul.f32 0.044715, %v2363_v31 }
 0x599   : > { %v4148_v12 = vadd.f32 %v4089_v34, %v2269_v58  ;;  %v3092_v1 = vpop.f32.mrb[46].mxu0  ;;  %v3264_v61 = vpop.eup %3263  ;;  %v2408_v19 = vadd.f32 %v2384_v48, %v4123_v4  ;;  %v2385_v10 = vmul.f32 0.044715, %v2361_v27 }
 0x59a   : > { %v2342_v39 = vmul.f32 %v4144_v28, %v4144_v28  ;;  %v2272_v60 = vpop.f32.mrb[47].mxu0  ;;  %v3266_v47 = vpop.eup %3265  ;;  %v2434_v42 = vmul.f32 0.7978846, %v2410_v33  ;;  %v2478_v3 = vadd.f32 1.0, %v3264_v61  ;;  %v2411_v49 = vadd.f32 %v2387_v22, %v4128_v23 }
 0x59b   : > { %v2340_v25 = vmul.f32 %v4148_v12, %v4148_v12  ;;  %v3268_v63 = vpop.eup %3267  ;;  %v2476_v0 = vadd.f32 1.0, %v3266_v47  ;;  %v2432_v51 = vmul.f32 0.7978846, %v2408_v19  ;;  %v2409_v20 = vadd.f32 %v2385_v10, %v4133_v44 }
 0x59c   : > { %v2366_v29 = vmul.f32 %v2342_v39, %v4144_v28  ;;  %v3270_v9 = vpop.eup %3269  ;;  %v4160_v7 = vadd.f32 %v3092_v1, %v4089_v34  ;;  %3271 = vtanh.f32 %v2434_v42  ;;  %v4163_v14 = vadd.f32 %v4089_v34, %v2272_v60 }
 0x59d   : > { %v2364_v24 = vmul.f32 %v2340_v25, %v4148_v12  ;;  %v2502_v50 = vmul.f32 0.5, %v2478_v3  ;;  %v2479_v15 = vadd.f32 1.0, %v3268_v63  ;;  %v2435_v35 = vmul.f32 0.7978846, %v2411_v49 }
 0x59e   : > { %v2390_v45 = vmul.f32 0.044715, %v2366_v29  ;;  %v2477_v56 = vadd.f32 1.0, %v3270_v9  ;;  %3273 = vtanh.f32 %v2432_v51  ;;  %v2343_v40 = vmul.f32 %v4160_v7, %v4160_v7 }
 0x59f   : > { %v3095_v46 = vpop.f32.mrb[48].mxu0  ;;  %v2388_v52 = vmul.f32 0.044715, %v2364_v24  ;;  %v2341_v18 = vmul.f32 %v4163_v14, %v4163_v14  ;;  %v2500_v57 = vmul.f32 0.5, %v2476_v0  ;;  %v2503_v59 = vmul.f32 0.5, %v2479_v15 }
 0x5a0   : > { %v2285_v37 = vpop.f32.mrb[49].mxu0  ;;  %v4166_v13 = vadd.f32 %v3095_v46, %v4089_v34  ;;  %v2414_v30 = vadd.f32 %v2390_v45, %v4144_v28  ;;  %v2433_v53 = vmul.f32 0.7978846, %v2409_v20  ;;  %v2501_v48 = vmul.f32 0.5, %v2477_v56 }
 0x5a1   : > { %v4169_v32 = vadd.f32 %v4089_v34, %v2285_v37  ;;  %v3096_v41 = vpop.f32.mrb[50].mxu0  ;;  %3275 = vtanh.f32 %v2435_v35  ;;  %v2412_v1 = vadd.f32 %v2388_v52, %v4148_v12  ;;  %v2367_v22 = vmul.f32 %v2343_v40, %v4160_v7 }
 0x5a2   : > { %v4172_v6 = vadd.f32 %v3096_v41, %v4089_v34  ;;  %v2288_v5 = vpop.f32.mrb[51].mxu0  ;;  %v2346_v54 = vmul.f32 %v4166_v13, %v4166_v13  ;;  %v2438_v33 = vmul.f32 0.7978846, %v2414_v30  ;;  %v2365_v61 = vmul.f32 %v2341_v18, %v4163_v14 }
 0x5a3   : > { %v2344_v43 = vmul.f32 %v4169_v32, %v4169_v32  ;;  %v4188_v8 = vadd.f32 %v4089_v34, %v2288_v5  ;;  %v4199_v42 = vmul.f32 %v2502_v50, %v4092_v21  ;;  %3277 = vtanh.f32 %v2433_v53 }
 0x5a4   : > { %v2347_v55 = vmul.f32 %v4172_v6, %v4172_v6  ;;  %v2370_v26 = vmul.f32 %v2346_v54, %v4166_v13  ;;  %v4202_v49 = vmul.f32 %v2500_v57, %v4095_v38  ;;  %v4205_v29 = vmul.f32 %v2503_v59, %v4100_v11 }
 0x5a5   : > { %v2368_v2 = vmul.f32 %v2344_v43, %v4169_v32  ;;  %v2345_v10 = vmul.f32 %v4188_v8, %v4188_v8  ;;  %v4208_v46 = vmul.f32 %v2501_v48, %v4105_v62  ;;  %3279 = vtanh.f32 %v2438_v33 }
 0x5a6   : > { %v2371_v31 = vmul.f32 %v2347_v55, %v4172_v6  ;;  %v2394_v17 = vmul.f32 0.044715, %v2370_v26  ;;  %v3272_v3 = vpop.eup %3271  ;;  %v2436_v9 = vmul.f32 0.7978846, %v2412_v1  ;;  %v2391_v45 = vmul.f32 0.044715, %v2367_v22 }
 0x5a7   : > { %v2392_v27 = vmul.f32 0.044715, %v2368_v2  ;;  %v3099_v58 = vpop.f32.mrb[52].mxu0  ;;  %v2389_v24 = vmul.f32 0.044715, %v2365_v61  ;;  %v2369_v37 = vmul.f32 %v2345_v10, %v4188_v8  ;;  %v2482_v11 = vadd.f32 1.0, %v3272_v3 }
 0x5a8   : > { %v2395_v39 = vmul.f32 0.044715, %v2371_v31  ;;  %v2301_v60 = vpop.f32.mrb[53].mxu0  ;;  %v2418_v19 = vadd.f32 %v2394_v17, %v4166_v13  ;;  %v3274_v21 = vpop.eup %3273  ;;  %v4213_v38 = vadd.f32 %v3099_v58, %v4089_v34  ;;  %v2415_v48 = vadd.f32 %v2391_v45, %v4160_v7 }
 0x5a9   : > { %v2416_v47 = vadd.f32 %v2392_v27, %v4169_v32  ;;  %v3100_v25 = vpop.f32.mrb[54].mxu0  ;;  %v4216_v50 = vadd.f32 %v4089_v34, %v2301_v60  ;;  %v2393_v62 = vmul.f32 0.044715, %v2369_v37  ;;  %v2480_v2 = vadd.f32 1.0, %v3274_v21 }
 0x5aa   : > { %v2442_v63 = vmul.f32 0.7978846, %v2418_v19  ;;  %v2304_v51 = vpop.f32.mrb[55].mxu0  ;;  %v2419_v20 = vadd.f32 %v2395_v39, %v4172_v6  ;;  %v2350_v15 = vmul.f32 %v4213_v38, %v4213_v38  ;;  %v4221_v35 = vadd.f32 %v3100_v25, %v4089_v34 }
 0x5ab   : > { %v2440_v0 = vmul.f32 0.7978846, %v2416_v47  ;;  %v2348_v56 = vmul.f32 %v4216_v50, %v4216_v50  ;;  %v4226_v54 = vadd.f32 %v4089_v34, %v2304_v51  ;;  %v3276_v52 = vpop.eup %3275  ;;  %v2417_v40 = vadd.f32 %v2393_v62, %v4188_v8 }
 0x5ac   : > { %3281 = vtanh.f32 %v2442_v63  ;;  %v2443_v41 = vmul.f32 0.7978846, %v2419_v20  ;;  %v2374_v55 = vmul.f32 %v2350_v15, %v4213_v38  ;;  %v2351_v18 = vmul.f32 %v4221_v35, %v4221_v35 }
 0x5ad   : > { %3283 = vtanh.f32 %v2440_v0  ;;  %v2372_v57 = vmul.f32 %v2348_v56, %v4216_v50  ;;  %v2349_v59 = vmul.f32 %v4226_v54, %v4226_v54  ;;  %v2441_v17 = vmul.f32 0.7978846, %v2417_v40  ;;  %v3278_v33 = vpop.eup %3277 }
 0x5ae   : > { %3285 = vtanh.f32 %v2443_v41  ;;  %v2398_v27 = vmul.f32 0.044715, %v2374_v55  ;;  %v2375_v58 = vmul.f32 %v2351_v18, %v4221_v35  ;;  %v2413_v1 = vadd.f32 %v2389_v24, %v4163_v14 }
 0x5af   : > { %v3103_v5 = vpop.f32.mrb[56].mxu0  ;;  %3287 = vtanh.f32 %v2436_v9  ;;  %v2396_v22 = vmul.f32 0.044715, %v2372_v57  ;;  %v2373_v39 = vmul.f32 %v2349_v59, %v4226_v54  ;;  %v2506_v61 = vmul.f32 0.5, %v2482_v11  ;;  %v3280_v10 = vpop.eup %3279 }
 0x5b0   : > { %v4229_v43 = vadd.f32 %v3103_v5, %v4089_v34  ;;  %v2317_v30 = vpop.f32.mrb[57].mxu0  ;;  %3289 = vtanh.f32 %v2441_v17  ;;  %v2422_v19 = vadd.f32 %v2398_v27, %v4213_v38  ;;  %v2399_v47 = vmul.f32 0.044715, %v2375_v58 }
 0x5b1   : > { %v3104_v26 = vpop.f32.mrb[58].mxu0  ;;  %v2483_v25 = vadd.f32 1.0, %v3276_v52  ;;  %v2420_v3 = vadd.f32 %v2396_v22, %v4216_v50  ;;  %v2397_v63 = vmul.f32 0.044715, %v2373_v39  ;;  %v2504_v51 = vmul.f32 0.5, %v2480_v2 }
 0x5b2   : > { %v2354_v53 = vmul.f32 %v4229_v43, %v4229_v43  ;;  %v2320_v31 = vpop.f32.mrb[59].mxu0  ;;  %v2481_v9 = vadd.f32 1.0, %v3278_v33  ;;  %v2446_v20 = vmul.f32 0.7978846, %v2422_v19  ;;  %v2423_v21 = vadd.f32 %v2399_v47, %v4221_v35 }
 0x5b3   : > { %v2439_v24 = vmul.f32 0.7978846, %v2415_v48  ;;  %v2444_v37 = vmul.f32 0.7978846, %v2420_v3  ;;  %v2421_v11 = vadd.f32 %v2397_v63, %v4226_v54  ;;  %v4251_v56 = vadd.f32 %v4089_v34, %v2317_v30 }
 0x5b4   : > { %v2378_v60 = vmul.f32 %v2354_v53, %v4229_v43  ;;  %3291 = vtanh.f32 %v2446_v20  ;;  %v2447_v5 = vmul.f32 0.7978846, %v2423_v21  ;;  %v2437_v40 = vmul.f32 0.7978846, %v2413_v1 }
 0x5b5   : > { %3293 = vtanh.f32 %v2444_v37  ;;  %v2445_v18 = vmul.f32 0.7978846, %v2421_v11  ;;  %v4256_v57 = vmul.f32 %v2506_v61, %v4120_v36  ;;  %v2507_v48 = vmul.f32 0.5, %v2483_v25 }
 0x5b6   : > { %v2402_v0 = vmul.f32 0.044715, %v2378_v60  ;;  %v3282_v45 = vpop.eup %3281  ;;  %3295 = vtanh.f32 %v2447_v5  ;;  %v2352_v33 = vmul.f32 %v4251_v56, %v4251_v56  ;;  %v4262_v1 = vadd.f32 %v3104_v26, %v4089_v34 }
 0x5b7   : > { %v3284_v62 = vpop.eup %3283  ;;  %v2490_v15 = vadd.f32 1.0, %v3282_v45  ;;  %3297 = vtanh.f32 %v2445_v18  ;;  %v2486_v22 = vadd.f32 1.0, %v3280_v10  ;;  %v4266_v39 = vadd.f32 %v4089_v34, %v2320_v31 }
 0x5b8   : > { %v2426_v41 = vadd.f32 %v2402_v0, %v4229_v43  ;;  %v3286_v52 = vpop.eup %3285  ;;  %v2488_v55 = vadd.f32 1.0, %v3284_v62  ;;  %v2355_v47 = vmul.f32 %v4262_v1, %v4262_v1  ;;  %v2528_v26 = vmul.f32 %v2504_v51, %v4123_v4 }
 0x5b9   : > { %v4253_v2 = vpop.eup %3287  ;;  %v2514_v59 = vmul.f32 0.5, %v2490_v15  ;;  %v2491_v53 = vadd.f32 1.0, %v3286_v52  ;;  %v2505_v34 = vmul.f32 0.5, %v2481_v9  ;;  %v2510_v4 = vmul.f32 0.5, %v2486_v22 }
 0x5ba   : > { %v2512_v17 = vmul.f32 0.5, %v2488_v55  ;;  %v2450_v27 = vmul.f32 0.7978846, %v2426_v41  ;;  %v3290_v60 = vpop.eup %3289 }
 0x5bb   : > { %v2538_v30 = vmul.f32 %v2514_v59, %v4166_v13  ;;  %v2515_v58 = vmul.f32 0.5, %v2491_v53  ;;  %v2376_v13 = vmul.f32 %v2352_v33, %v4251_v56  ;;  %v2489_v25 = vadd.f32 1.0, %v3290_v60 }
 0x5bc   : > { %v2536_v36 = vmul.f32 %v2512_v17, %v4169_v32  ;;  %3299 = vtanh.f32 %v2450_v27  ;;  %v2353_v32 = vmul.f32 %v4266_v39, %v4266_v39 }
 0x5bd   : > { %v2550_v61 = vsub.f32 %v4199_v42, %v2538_v30  ;;  %v2539_v19 = vmul.f32 %v2515_v58, %v4172_v6  ;;  %v2400_v3 = vmul.f32 0.044715, %v2376_v13  ;;  %v2379_v42 = vmul.f32 %v2355_v47, %v4262_v1 }
 0x5be   : > { %v2548_v10 = vsub.f32 %v4202_v49, %v2536_v36  ;;  %v2531_v6 = vmul.f32 %v2507_v48, %v4128_v23  ;;  %3301 = vtanh.f32 %v2439_v24  ;;  %v2513_v63 = vmul.f32 0.5, %v2489_v25  ;;  %v3292_v20 = vpop.eup %3291 }
 0x5bf   : > { %v2551_v31 = vsub.f32 %v4205_v29, %v2539_v19  ;;  %v2377_v0 = vmul.f32 %v2353_v32, %v4266_v39  ;;  %3303 = vtanh.f32 %v2437_v40  ;;  %v2424_v49 = vadd.f32 %v2400_v3, %v4251_v56  ;;  %v3294_v21 = vpop.eup %3293 }
 0x5c0   : > { %v2403_v51 = vmul.f32 0.044715, %v2379_v42  ;;  %v2562_v45 = vmul.f32 %v2550_v61, %v2550_v61  ;;  %v2537_v9 = vmul.f32 %v2513_v63, %v4188_v8  ;;  %v2494_v29 = vadd.f32 1.0, %v3292_v20  ;;  %v3296_v11 = vpop.eup %3295 }
 0x5c1   : > { %v2401_v37 = vmul.f32 0.044715, %v2377_v0  ;;  %v2560_v41 = vmul.f32 %v2548_v10, %v2548_v10  ;;  %v2492_v62 = vadd.f32 1.0, %v3294_v21  ;;  %v2448_v23 = vmul.f32 0.7978846, %v2424_v49  ;;  %v3298_v15 = vpop.eup %3297 }
 0x5c2   : > { %v2427_v24 = vadd.f32 %v2403_v51, %v4262_v1  ;;  %v2549_v5 = vsub.f32 %v4208_v46, %v2537_v9  ;;  %v2518_v52 = vmul.f32 0.5, %v2494_v29  ;;  %v2495_v40 = vadd.f32 1.0, %v3296_v11 }
 0x5c3   : > { %v2425_v55 = vadd.f32 %v2401_v37, %v4266_v39  ;;  %v2516_v18 = vmul.f32 0.5, %v2492_v62  ;;  %v2493_v59 = vadd.f32 1.0, %v3298_v15  ;;  %3305 = vtanh.f32 %v2448_v23 }
 0x5c4   : > { %v2451_v53 = vmul.f32 0.7978846, %v2427_v24  ;;  %v2561_v48 = vmul.f32 %v2549_v5, %v2549_v5  ;;  %v2542_v17 = vmul.f32 %v2518_v52, %v4213_v38  ;;  %v2519_v27 = vmul.f32 0.5, %v2495_v40 }
 0x5c5   : > { %v2449_v30 = vmul.f32 0.7978846, %v2425_v55  ;;  %v2540_v58 = vmul.f32 %v2516_v18, %v4216_v50  ;;  %v2517_v33 = vmul.f32 0.5, %v2493_v59  ;;  %v2529_v61 = vmul.f32 %v2505_v34, %v4133_v44 }
 0x5c6   : > { %v3300_v8 = vpop.eup %3299  ;;  %3307 = vtanh.f32 %v2451_v53  ;;  %v2572_v46 = vadd.f32 %v2561_v48, %v2560_v41  ;;  %v2554_v36 = vsub.f32 %v4256_v57, %v2542_v17  ;;  %v2543_v60 = vmul.f32 %v2519_v27, %v4221_v35 }
 0x5c7   : > { %v2498_v22 = vadd.f32 1.0, %v3300_v8  ;;  %3309 = vtanh.f32 %v2449_v30  ;;  %v2552_v19 = vsub.f32 %v2528_v26, %v2540_v58  ;;  %v2541_v13 = vmul.f32 %v2517_v33, %v4226_v54 }
 0x5c8   : > { %v3302_v38 = vpop.eup %3301  ;;  %v2563_v10 = vmul.f32 %v2551_v31, %v2551_v31  ;;  %v2573_v25 = vadd.f32 %v2572_v46, %v2562_v45  ;;  %v2555_v32 = vsub.f32 %v2531_v6, %v2543_v60  ;;  %v2534_v3 = vmul.f32 %v2510_v4, %v4144_v28 }
 0x5c9   : > { %v2522_v47 = vmul.f32 0.5, %v2498_v22  ;;  %v3304_v50 = vpop.eup %3303  ;;  %v2564_v42 = vmul.f32 %v2552_v19, %v2552_v19  ;;  %v2553_v63 = vsub.f32 %v2529_v61, %v2541_v13  ;;  %v2484_v35 = vadd.f32 1.0, %v4253_v2 }
 0x5ca   : > { %v2574_v0 = vadd.f32 %v2573_v25, %v2563_v10  ;;  %v2487_v20 = vadd.f32 1.0, %v3302_v38  ;;  %v2485_v49 = vadd.f32 1.0, %v3304_v50  ;;  %v2566_v31 = vmul.f32 %v2554_v36, %v2554_v36 }
 0x5cb   : > { %v2546_v57 = vmul.f32 %v2522_v47, %v4229_v43  ;;  %v2565_v44 = vmul.f32 %v2553_v63, %v2553_v63  ;;  %v2508_v51 = vmul.f32 0.5, %v2484_v35  ;;  %v2567_v4 = vmul.f32 %v2555_v32, %v2555_v32 }
 0x5cc   : > { %v2575_v34 = vadd.f32 %v2574_v0, %v2564_v42  ;;  %v2511_v9 = vmul.f32 0.5, %v2487_v20  ;;  %v2509_v11 = vmul.f32 0.5, %v2485_v49 }
 0x5cd   : > { %v2558_v26 = vsub.f32 %v2534_v3, %v2546_v57  ;;  %v3306_v54 = vpop.eup %3305  ;;  %v2532_v41 = vmul.f32 %v2508_v51, %v4148_v12 }
 0x5ce   : > { %v2576_v21 = vadd.f32 %v2575_v34, %v2565_v44  ;;  %v2496_v6 = vadd.f32 1.0, %v3306_v54  ;;  %v2535_v5 = vmul.f32 %v2511_v9, %v4160_v7  ;;  %v2533_v55 = vmul.f32 %v2509_v11, %v4163_v14 }
 0x5cf   : > { %v2570_v17 = vmul.f32 %v2558_v26, %v2558_v26 }
 0x5d0   : > { %v3308_v45 = vpop.eup %3307  ;;  %v2577_v29 = vadd.f32 %v2576_v21, %v2566_v31  ;;  %v2520_v37 = vmul.f32 0.5, %v2496_v6 }
 0x5d1   : > { %v3310_v28 = vpop.eup %3309  ;;  %v2499_v43 = vadd.f32 1.0, %v3308_v45 }
 0x5d2   : > { %v2497_v2 = vadd.f32 1.0, %v3310_v28  ;;  %v2544_v62 = vmul.f32 %v2520_v37, %v4251_v56  ;;  %v2578_v23 = vadd.f32 %v2577_v29, %v2567_v4 }
 0x5d3   : > { %v2523_v24 = vmul.f32 0.5, %v2499_v43 }
 0x5d4   : > { %v2521_v15 = vmul.f32 0.5, %v2497_v2  ;;  %v2556_v52 = vsub.f32 %v2532_v41, %v2544_v62 }
 0x5d5   : > { %v2547_v40 = vmul.f32 %v2523_v24, %v4262_v1 }
 0x5d6   : > { %v2545_v18 = vmul.f32 %v2521_v15, %v4266_v39  ;;  %v2568_v59 = vmul.f32 %v2556_v52, %v2556_v52 }
 0x5d7   : > { %v2559_v53 = vsub.f32 %v2535_v5, %v2547_v40 }
 0x5d8   : > { %v2557_v8 = vsub.f32 %v2533_v55, %v2545_v18  ;;  %v2579_v48 = vadd.f32 %v2578_v23, %v2568_v59 }
 0x5d9   : > { %v2571_v27 = vmul.f32 %v2559_v53, %v2559_v53 }
 0x5da   : > { %v2569_v12 = vmul.f32 %v2557_v8, %v2557_v8 }
 0x5dc   : > { %v2580_v56 = vadd.f32 %v2579_v48, %v2569_v12 }
 0x5de   : > { %v2581_v30 = vadd.f32 %v2580_v56, %v2570_v17 }
 0x5e0   : > { %v2582_v58 = vadd.f32 %v2581_v30, %v2571_v27 }
 0x5e2   : > { %v2583_v33 = vrot.slane %v2582_v58, 4 }
 0x5e4   : > { %v2584_v7 = vadd.f32 %v2583_v33, %v2582_v58 }
 0x5e6   : > { %v2585_v22 = vrot.slane %v2584_v7, 2 }
 0x5e8   : > { %v2586_v46 = vadd.f32 %v2585_v22, %v2584_v7 }
 0x5ea   : > { %v2587_v1 = vrot.slane %v2586_v46, 1 }
 0x5ec   : > { %v2588_v36 = vadd.f32 %v2587_v1, %v2586_v46 }
 0x5ee   : > { %v2589_v14 = vadd.f32 %v2588_v36, %v4084_v16 }
 0x5f0   : > { %2590 = vst [vmem:[%s321_s26] sm:$0x1] %v2589_v14 }
 0x5f1 PF: > { %s18_s27 = sadd.s32 1, %s3317_s27  }
 0x5f2   : > { %p15_p4 = scmp.ge.s32.totalorder %s18_s27, 4  }
 0x5f4   :  { %17 = sbr.rel (!%p15_p4) target bundleno = 1 (0x1), region = 89 }

</bundles_post_ra>
